<compile_context>
chip_gen: v5e
topology: v5e:2x2
jax: 0.10.0
libtpu: 0.0.40
codegen_flags: <defaults>
</compile_context>

<pallas_src>
import functools

import jax
import jax.numpy as jnp
from jax.experimental import pallas as pl
from jax.experimental.pallas import tpu as pltpu


_PARAM_ORDER = ("wqkv", "bqkv", "wo", "bo", "ln1_g", "ln1_b",
                "w1", "b1", "w2", "b2", "ln2_g", "ln2_b")

# The original repo's EncoderLayer LayerNorms use eps=1e-6.
_LN_EPS = 1e-6


def _layer_norm(v, g, b, eps=_LN_EPS):
    mu = jnp.mean(v, axis=-1, keepdims=True)
    var = jnp.mean((v - mu) ** 2, axis=-1, keepdims=True)
    return (v - mu) * jax.lax.rsqrt(var + eps) * g + b


# ----------------------------------------------------------------------------
# Fused kernel: grid = (batch_blocks, layer).  Bt batch rows resident per step,
# the layer axis is sequential ("arbitrary") and carries the activation in VMEM.
# ----------------------------------------------------------------------------
def _encoder_stack_kernel(n_head,
                          x_ref, bias_ref,
                          wqkv_ref, bqkv_ref, wo_ref, bo_ref,
                          ln1g_ref, ln1b_ref, w1_ref, b1_ref,
                          w2_ref, b2_ref, ln2g_ref, ln2b_ref,
                          o_ref, act_ref, ctx_ref):
    l = pl.program_id(1)

    @pl.when(l == 0)
    def _():
        act_ref[...] = x_ref[...]          # load embeddings into the carried act

    x = act_ref[...]                       # (Bt, S, D) f32
    Bt, S, D = x.shape
    d_k = D // n_head
    x2 = x.reshape(Bt * S, D)

    # --- Fused Q/K/V projection: one lane-dense matmul, N = 3D, K = D -------
    qkv = jnp.dot(x2.astype(jnp.bfloat16), wqkv_ref[0],
                  preferred_element_type=jnp.float32) + bqkv_ref[0]  # (Bt*S, 3D)

    q = qkv[:, :D].reshape(Bt, S, D)
    k = qkv[:, D:2 * D].reshape(Bt, S, D)
    v = qkv[:, 2 * D:].reshape(Bt, S, D)

    # Additive key-pad bias, precomputed in the wrapper (no per-layer compare).
    bias = bias_ref[...]                   # (Bt, 1, S) f32

    # --- Per-head attention core (inherently d_k-deep matmuls) --------------
    # The 1/sqrt(d_k) temperature is already folded into wq / bq.
    # TODO(synk): flash-style K-axis tiling for large S.
    for h in range(n_head):
        sl = slice(h * d_k, (h + 1) * d_k)
        qh = q[:, :, sl].astype(jnp.bfloat16)
        kh = k[:, :, sl].astype(jnp.bfloat16)
        vh = v[:, :, sl].astype(jnp.bfloat16)

        s = jnp.einsum("bqd,bkd->bqk", qh, kh,
                       preferred_element_type=jnp.float32) + bias    # (Bt,S,S)
        s = s - jnp.max(s, axis=-1, keepdims=True)
        p = jnp.exp(s)
        p = p * pl.reciprocal(jnp.sum(p, axis=-1, keepdims=True), approx=True)

        ctxh = jnp.einsum("bqk,bkd->bqd", p.astype(jnp.bfloat16), vh,
                          preferred_element_type=jnp.float32)        # (Bt,S,dk)
        # Merge heads back into a flat (Bt*S, D) slab (static lane-slice store)
        ctx_ref[:, sl] = ctxh.reshape(Bt * S, d_k)

    # --- Output projection: ONE deep-K (= H*d_k = D) matmul -----------------
    attn = jnp.dot(ctx_ref[...].astype(jnp.bfloat16), wo_ref[0],
                   preferred_element_type=jnp.float32) + bo_ref[0]   # (Bt*S, D)

    y = _layer_norm(x2 + attn, ln1g_ref[0], ln1b_ref[0])

    # --- Position-wise feed forward ------------------------------------------
    h1 = jnp.maximum(
        jnp.dot(y.astype(jnp.bfloat16), w1_ref[0],
                preferred_element_type=jnp.float32) + b1_ref[0], 0.0)
    z = jnp.dot(h1.astype(jnp.bfloat16), w2_ref[0],
                preferred_element_type=jnp.float32) + b2_ref[0]
    out = _layer_norm(y + z, ln2g_ref[0], ln2b_ref[0]).reshape(Bt, S, D)

    act_ref[...] = out                     # carry to the next layer step

    @pl.when(l == pl.num_programs(1) - 1)
    def _():
        o_ref[...] = out                   # write the output tile once


def _pick_batch_tile(B):
    """Largest Bt dividing B that still leaves >= 2 parallel grid steps.

    On v7x (2 TCs) this keeps both cores busy; on 1-TC chips (v5e/v6e) callers
    may pass batch_tile=B to maximally amortize the per-layer weight DMA.
    """
    for bt in range(B // 2, 0, -1):
        if B % bt == 0:
            return bt
    return B


def encoder_stack_pallas(x, mask, sp, *, n_head, batch_tile=None):
    """Run the full layer stack. x: (B, S, D) f32, mask: (B, S) valid mask."""
    B, S, D = x.shape
    n_layer = sp["wqkv"].shape[0]
    Bt = _pick_batch_tile(B) if batch_tile is None else batch_tile
    assert B % Bt == 0, "batch_tile must divide the batch size"

    # Key-pad -> additive bias, computed ONCE in the wrapper (explicit cast so
    # bool / int / float masks all behave identically).
    bias = jnp.where(mask != 0, 0.0, -1e9).astype(jnp.float32).reshape(B, 1, S)

    def wspec(arr):
        blk = (1,) + arr.shape[1:]
        zeros = (0,) * (arr.ndim - 1)
        return pl.BlockSpec(blk, lambda b, l, z=zeros: (l,) + z)

    in_specs = [
        pl.BlockSpec((Bt, S, D), lambda b, l: (b, 0, 0)),   # activations (emb)
        pl.BlockSpec((Bt, 1, S), lambda b, l: (b, 0, 0)),   # additive pad bias
    ] + [wspec(sp[name]) for name in _PARAM_ORDER]

    kernel = functools.partial(_encoder_stack_kernel, n_head)

    return pl.pallas_call(
        kernel,
        out_shape=jax.ShapeDtypeStruct((B, S, D), jnp.float32),
        grid=(B // Bt, n_layer),
        in_specs=in_specs,
        out_specs=pl.BlockSpec((Bt, S, D), lambda b, l: (b, 0, 0)),
        scratch_shapes=[pltpu.VMEM((Bt, S, D), jnp.float32),      # carried act
                        pltpu.VMEM((Bt * S, D), jnp.float32)],    # merged ctx
        compiler_params=pltpu.CompilerParams(
            dimension_semantics=("parallel", "arbitrary"),
            vmem_limit_bytes=48 * 1024 * 1024),
    )(x, bias, *[sp[name] for name in _PARAM_ORDER])


# ----------------------------------------------------------------------------
# Parameter init (deterministic, synthetic) and stacking into kernel layout.
# ----------------------------------------------------------------------------
def init_encoder_params(key, *, n_src_vocab, d_word_vec, n_layer, n_head,
                        d_model, d_inner, pad_idx, max_seq_len):
    def nrm(k, shape, scale=0.02):
        return (scale * jax.random.normal(k, shape)).astype(jnp.float32)

    keys = jax.random.split(key, 2 + n_layer)
    word_emb = nrm(keys[0], (n_src_vocab, d_word_vec), 0.1)
    word_emb = word_emb.at[pad_idx].set(0.0)          # padding_idx row is zero
    pos_emb = nrm(keys[1], (max_seq_len, d_word_vec), 0.1)

    layers = []
    for li in range(n_layer):
        ks = jax.random.split(keys[2 + li], 6)
        layers.append(dict(
            wq=nrm(ks[0], (d_model, d_model)), bq=jnp.zeros((1, d_model), jnp.float32),
            wk=nrm(ks[1], (d_model, d_model)), bk=jnp.zeros((1, d_model), jnp.float32),
            wv=nrm(ks[2], (d_model, d_model)), bv=jnp.zeros((1, d_model), jnp.float32),
            wo=nrm(ks[3], (d_model, d_model)), bo=jnp.zeros((1, d_model), jnp.float32),
            ln1_g=jnp.ones((1, d_model), jnp.float32),
            ln1_b=jnp.zeros((1, d_model), jnp.float32),
            w1=nrm(ks[4], (d_model, d_inner)), b1=jnp.zeros((1, d_inner), jnp.float32),
            w2=nrm(ks[5], (d_inner, d_model)), b2=jnp.zeros((1, d_model), jnp.float32),
            ln2_g=jnp.ones((1, d_model), jnp.float32),
            ln2_b=jnp.zeros((1, d_model), jnp.float32),
        ))
    stacked = stack_encoder_layers(layers, n_head=n_head)
    return dict(word_emb=word_emb, pos_emb=pos_emb, stacked=stacked)


def stack_encoder_layers(layers, *, n_head):
    """Stack per-layer weights along a leading layer axis in kernel layout.

    * Wq/Wk/Wv are fused column-wise into a single (D, 3D) Wqkv (bf16).
    * The 1/sqrt(d_k) softmax temperature is folded into Wq and bq here
      (free preprocessing; removes the per-step score scaling).
    * Wo stays a flat (D, D) matrix; head h of the merged context multiplies
      rows [h*d_k, (h+1)*d_k) — identical to concat(heads) @ Wo.
    """
    d_model = layers[0]["wq"].shape[0]
    d_k = d_model // n_head
    inv_temp = 1.0 / (d_k ** 0.5)
    bf = jnp.bfloat16

    def stk(name):
        return jnp.stack([lp[name] for lp in layers], axis=0)

    wq = stk("wq") * inv_temp
    bq = stk("bq") * inv_temp
    wqkv = jnp.concatenate([wq, stk("wk"), stk("wv")], axis=-1)   # (L, D, 3D)
    bqkv = jnp.concatenate([bq, stk("bk"), stk("bv")], axis=-1)   # (L, 1, 3D)

    return dict(
        wqkv=wqkv.astype(bf), bqkv=bqkv.astype(jnp.float32),
        wo=stk("wo").astype(bf), bo=stk("bo"),
        ln1_g=stk("ln1_g"), ln1_b=stk("ln1_b"),
        w1=stk("w1").astype(bf), b1=stk("b1"),
        w2=stk("w2").astype(bf), b2=stk("b2"),
        ln2_g=stk("ln2_g"), ln2_b=stk("ln2_b"),
    )


# ----------------------------------------------------------------------------
# Full Encoder forward (embedding gathers are plain-JAX glue).
# ----------------------------------------------------------------------------
def encoder_forward(src_seq, src_attn_mask, params, *, n_head, batch_tile=None):
    """src_seq: (B, S) int32 token ids, src_attn_mask: (B, S) 1/0 valid mask."""
    B, S = src_seq.shape
    emb_word = jnp.take(params["word_emb"], src_seq, axis=0)          # (B, S, D)
    emb_posi = jnp.take(params["pos_emb"], jnp.arange(S), axis=0)     # (S, D)
    enc_output = (emb_word + emb_posi[None]).astype(jnp.float32)
    # dropout -> identity at inference.

    enc_slf_attn_list = []   # return_attn=False path
    enc_output = encoder_stack_pallas(enc_output, src_attn_mask,
                                      params["stacked"], n_head=n_head,
                                      batch_tile=batch_tile)
    return enc_output, enc_slf_attn_list


# ----------------------------------------------------------------------------
if __name__ == "__main__":
    n_src_vocab = 50
    d_word_vec = d_model = 128     # multiple of 128 -> lane-dense blocks
    n_layer = 2
    n_head = 4
    d_inner = 256
    pad_idx = 0
    max_seq_len = 32
    B, S = 2, 8

    key = jax.random.PRNGKey(0)
    k_param, k_seq = jax.random.split(key)

    params = init_encoder_params(
        k_param, n_src_vocab=n_src_vocab, d_word_vec=d_word_vec,
        n_layer=n_layer, n_head=n_head, d_model=d_model, d_inner=d_inner,
        pad_idx=pad_idx, max_seq_len=max_seq_len)

    src_seq = jax.random.randint(k_seq, (B, S), 1, n_src_vocab, dtype=jnp.int32)
    src_seq = src_seq.at[1, 6:].set(pad_idx)            # introduce some padding
    src_attn_mask = (src_seq != pad_idx).astype(jnp.int32)

    enc_out, attn_list = encoder_forward(src_seq, src_attn_mask, params,
                                         n_head=n_head)
    enc_out = jax.block_until_ready(enc_out)
    assert enc_out.shape == (B, S, d_model)
    assert bool(jnp.all(jnp.isfinite(enc_out)))
    print("KERNEL_OK")
</pallas_src>

<mosaic_0001>
module attributes {stable_mosaic.version = 11 : i64} {
  func.func @_encoder_stack_kernel(%arg0: i32, %arg1: i32, %arg2: memref<1x8x128xf32, #tpu.memory_space<vmem>>, %arg3: memref<1x1x8xf32, #tpu.memory_space<vmem>>, %arg4: memref<1x128x384xbf16, #tpu.memory_space<vmem>>, %arg5: memref<1x1x384xf32, #tpu.memory_space<vmem>>, %arg6: memref<1x128x128xbf16, #tpu.memory_space<vmem>>, %arg7: memref<1x1x128xf32, #tpu.memory_space<vmem>>, %arg8: memref<1x1x128xf32, #tpu.memory_space<vmem>>, %arg9: memref<1x1x128xf32, #tpu.memory_space<vmem>>, %arg10: memref<1x128x256xbf16, #tpu.memory_space<vmem>>, %arg11: memref<1x1x256xf32, #tpu.memory_space<vmem>>, %arg12: memref<1x256x128xbf16, #tpu.memory_space<vmem>>, %arg13: memref<1x1x128xf32, #tpu.memory_space<vmem>>, %arg14: memref<1x1x128xf32, #tpu.memory_space<vmem>>, %arg15: memref<1x1x128xf32, #tpu.memory_space<vmem>>, %arg16: memref<1x8x128xf32, #tpu.memory_space<vmem>>, %arg17: memref<1x8x128xf32, #tpu.memory_space<vmem>>, %arg18: memref<8x128xf32, #tpu.memory_space<vmem>>) attributes {dimension_semantics = [#tpu.dimension_semantics<parallel>, #tpu.dimension_semantics<arbitrary>], iteration_bounds = array<i64: 2, 2>, scalar_prefetch = 0 : i64, scratch_operands = 2 : i64, tpu.core_type = #tpu.core_type<tc>, window_params = [{transform_indices = @transform_0, window_bounds = array<i64: 1, 8, 128>}, {transform_indices = @transform_1, window_bounds = array<i64: 1, 1, 8>}, {transform_indices = @transform_2, window_bounds = array<i64: 1, 128, 384>}, {transform_indices = @transform_3, window_bounds = array<i64: 1, 1, 384>}, {transform_indices = @transform_4, window_bounds = array<i64: 1, 128, 128>}, {transform_indices = @transform_5, window_bounds = array<i64: 1, 1, 128>}, {transform_indices = @transform_6, window_bounds = array<i64: 1, 1, 128>}, {transform_indices = @transform_7, window_bounds = array<i64: 1, 1, 128>}, {transform_indices = @transform_8, window_bounds = array<i64: 1, 128, 256>}, {transform_indices = @transform_9, window_bounds = array<i64: 1, 1, 256>}, {transform_indices = @transform_10, window_bounds = array<i64: 1, 256, 128>}, {transform_indices = @transform_11, window_bounds = array<i64: 1, 1, 128>}, {transform_indices = @transform_12, window_bounds = array<i64: 1, 1, 128>}, {transform_indices = @transform_13, window_bounds = array<i64: 1, 1, 128>}, {transform_indices = @transform_14, window_bounds = array<i64: 1, 8, 128>}]} {
    %c0_i32 = arith.constant 0 : i32
    %0 = arith.cmpi eq, %arg1, %c0_i32 : i32
    %1 = arith.extui %0 : i1 to i32
    %c0_i32_0 = arith.constant 0 : i32
    %2 = arith.cmpi ne, %1, %c0_i32_0 : i32
    scf.if %2 {
      %c0_83 = arith.constant 0 : index
      %c0_84 = arith.constant 0 : index
      %c0_85 = arith.constant 0 : index
      %198 = vector.load %arg2[%c0_83, %c0_84, %c0_85] : memref<1x8x128xf32, #tpu.memory_space<vmem>>, vector<1x8x128xf32>
      %c0_86 = arith.constant 0 : index
      %c0_87 = arith.constant 0 : index
      %c0_88 = arith.constant 0 : index
      %199 = vector.load %arg17[%c0_86, %c0_87, %c0_88] : memref<1x8x128xf32, #tpu.memory_space<vmem>>, vector<1x8x128xf32>
      tpu.vector_store %arg17[%c0_86, %c0_87, %c0_88], %198 {strides = array<i32>} : memref<1x8x128xf32, #tpu.memory_space<vmem>>, vector<1x8x128xf32>,
    } else {
    }
    %c0 = arith.constant 0 : index
    %c0_1 = arith.constant 0 : index
    %c0_2 = arith.constant 0 : index
    %3 = vector.load %arg17[%c0, %c0_1, %c0_2] : memref<1x8x128xf32, #tpu.memory_space<vmem>>, vector<1x8x128xf32>
    %4 = vector.shape_cast %3 : vector<1x8x128xf32> to vector<8x128xf32>
    %5 = arith.truncf %4 : vector<8x128xf32> to vector<8x128xbf16>
    %c0_3 = arith.constant 0 : index
    %c0_4 = arith.constant 0 : index
    %c0_5 = arith.constant 0 : index
    %6 = vector.load %arg4[%c0_3, %c0_4, %c0_5] : memref<1x128x384xbf16, #tpu.memory_space<vmem>>, vector<1x128x384xbf16>
    %7 = vector.shape_cast %6 : vector<1x128x384xbf16> to vector<128x384xbf16>
    %cst = arith.constant dense<0.000000e+00> : vector<8x384xf32>
    %8 = tpu.matmul %5, %7, %cst {dimension_numbers = #tpu.dot_dimension_numbers<[1], [0], [0], [1], [0, 0, 1, 1], [], []>} : vector<8x128xbf16>, vector<128x384xbf16>, vector<8x384xf32> -> vector<8x384xf32>
    %c0_6 = arith.constant 0 : index
    %c0_7 = arith.constant 0 : index
    %c0_8 = arith.constant 0 : index
    %9 = vector.load %arg5[%c0_6, %c0_7, %c0_8] : memref<1x1x384xf32, #tpu.memory_space<vmem>>, vector<1x1x384xf32>
    %10 = vector.shape_cast %9 : vector<1x1x384xf32> to vector<1x384xf32>
    %11 = vector.broadcast %10 : vector<1x384xf32> to vector<8x384xf32>
    %12 = arith.addf %8, %11 : vector<8x384xf32>
    %13 = vector.extract_strided_slice %12 {offsets = [0, 0], sizes = [8, 128], strides = [1, 1]} : vector<8x384xf32> to vector<8x128xf32>
    %14 = vector.shape_cast %13 : vector<8x128xf32> to vector<1x8x128xf32>
    %15 = vector.extract_strided_slice %12 {offsets = [0, 128], sizes = [8, 128], strides = [1, 1]} : vector<8x384xf32> to vector<8x128xf32>
    %16 = vector.shape_cast %15 : vector<8x128xf32> to vector<1x8x128xf32>
    %17 = vector.extract_strided_slice %12 {offsets = [0, 256], sizes = [8, 128], strides = [1, 1]} : vector<8x384xf32> to vector<8x128xf32>
    %18 = vector.shape_cast %17 : vector<8x128xf32> to vector<1x8x128xf32>
    %c0_9 = arith.constant 0 : index
    %c0_10 = arith.constant 0 : index
    %c0_11 = arith.constant 0 : index
    %19 = vector.load %arg3[%c0_9, %c0_10, %c0_11] : memref<1x1x8xf32, #tpu.memory_space<vmem>>, vector<1x1x8xf32>
    %20 = vector.extract_strided_slice %14 {offsets = [0, 0, 0], sizes = [1, 8, 32], strides = [1, 1, 1]} : vector<1x8x128xf32> to vector<1x8x32xf32>
    %21 = arith.truncf %20 : vector<1x8x32xf32> to vector<1x8x32xbf16>
    %22 = vector.extract_strided_slice %16 {offsets = [0, 0, 0], sizes = [1, 8, 32], strides = [1, 1, 1]} : vector<1x8x128xf32> to vector<1x8x32xf32>
    %23 = arith.truncf %22 : vector<1x8x32xf32> to vector<1x8x32xbf16>
    %24 = vector.extract_strided_slice %18 {offsets = [0, 0, 0], sizes = [1, 8, 32], strides = [1, 1, 1]} : vector<1x8x128xf32> to vector<1x8x32xf32>
    %25 = arith.truncf %24 : vector<1x8x32xf32> to vector<1x8x32xbf16>
    "tpu.trace_start"() <{level = 10 : i32, message = "bqd,bkd->bqk"}> : () -> ()
    %cst_12 = arith.constant dense<0.000000e+00> : vector<1x8x8xf32>
    %26 = tpu.matmul %21, %23, %cst_12 {dimension_numbers = #tpu.dot_dimension_numbers<[2], [2], [1], [1], [0, 0, 0, 1, 1, 1], [0], [0]>} : vector<1x8x32xbf16>, vector<1x8x32xbf16>, vector<1x8x8xf32> -> vector<1x8x8xf32>
    "tpu.trace_stop"() : () -> ()
    %27 = vector.broadcast %19 : vector<1x1x8xf32> to vector<1x8x8xf32>
    %28 = arith.addf %26, %27 : vector<1x8x8xf32>
    %cst_13 = arith.constant dense<0xFF800000> : vector<1x8xf32>
    %29 = vector.multi_reduction <maximumf>, %28, %cst_13 [2] : vector<1x8x8xf32> to vector<1x8xf32>
    %30 = vector.shape_cast %29 : vector<1x8xf32> to vector<1x8x1xf32>
    %31 = vector.broadcast %30 : vector<1x8x1xf32> to vector<1x8x8xf32>
    %32 = arith.subf %28, %31 : vector<1x8x8xf32>
    %33 = math.exp %32 : vector<1x8x8xf32>
    %cst_14 = arith.constant dense<0.000000e+00> : vector<1x8xf32>
    %34 = vector.multi_reduction <add>, %33, %cst_14 [2] : vector<1x8x8xf32> to vector<1x8xf32>
    %35 = vector.shape_cast %34 : vector<1x8xf32> to vector<1x8x1xf32>
    %36 = tpu.reciprocal %35 {approx = true} : vector<1x8x1xf32> -> vector<1x8x1xf32>
    %37 = vector.broadcast %36 : vector<1x8x1xf32> to vector<1x8x8xf32>
    %38 = arith.mulf %33, %37 : vector<1x8x8xf32>
    %39 = arith.truncf %38 : vector<1x8x8xf32> to vector<1x8x8xbf16>
    "tpu.trace_start"() <{level = 10 : i32, message = "bqk,bkd->bqd"}> : () -> ()
    %cst_15 = arith.constant dense<0.000000e+00> : vector<1x8x32xf32>
    %40 = tpu.matmul %39, %25, %cst_15 {dimension_numbers = #tpu.dot_dimension_numbers<[2], [1], [1], [2], [0, 0, 0, 1, 1, 2], [0], [0]>} : vector<1x8x8xbf16>, vector<1x8x32xbf16>, vector<1x8x32xf32> -> vector<1x8x32xf32>
    "tpu.trace_stop"() : () -> ()
    %41 = vector.shape_cast %40 : vector<1x8x32xf32> to vector<8x32xf32>
    %c0_16 = arith.constant 0 : index
    %c0_17 = arith.constant 0 : index
    %42 = vector.load %arg18[%c0_16, %c0_17] : memref<8x128xf32, #tpu.memory_space<vmem>>, vector<8x32xf32>
    tpu.vector_store %arg18[%c0_16, %c0_17], %41 {strides = array<i32>} : memref<8x128xf32, #tpu.memory_space<vmem>>, vector<8x32xf32>,
    %43 = vector.extract_strided_slice %14 {offsets = [0, 0, 32], sizes = [1, 8, 32], strides = [1, 1, 1]} : vector<1x8x128xf32> to vector<1x8x32xf32>
    %44 = arith.truncf %43 : vector<1x8x32xf32> to vector<1x8x32xbf16>
    %45 = vector.extract_strided_slice %16 {offsets = [0, 0, 32], sizes = [1, 8, 32], strides = [1, 1, 1]} : vector<1x8x128xf32> to vector<1x8x32xf32>
    %46 = arith.truncf %45 : vector<1x8x32xf32> to vector<1x8x32xbf16>
    %47 = vector.extract_strided_slice %18 {offsets = [0, 0, 32], sizes = [1, 8, 32], strides = [1, 1, 1]} : vector<1x8x128xf32> to vector<1x8x32xf32>
    %48 = arith.truncf %47 : vector<1x8x32xf32> to vector<1x8x32xbf16>
    "tpu.trace_start"() <{level = 10 : i32, message = "bqd,bkd->bqk"}> : () -> ()
    %cst_18 = arith.constant dense<0.000000e+00> : vector<1x8x8xf32>
    %49 = tpu.matmul %44, %46, %cst_18 {dimension_numbers = #tpu.dot_dimension_numbers<[2], [2], [1], [1], [0, 0, 0, 1, 1, 1], [0], [0]>} : vector<1x8x32xbf16>, vector<1x8x32xbf16>, vector<1x8x8xf32> -> vector<1x8x8xf32>
    "tpu.trace_stop"() : () -> ()
    %50 = vector.broadcast %19 : vector<1x1x8xf32> to vector<1x8x8xf32>
    %51 = arith.addf %49, %50 : vector<1x8x8xf32>
    %cst_19 = arith.constant dense<0xFF800000> : vector<1x8xf32>
    %52 = vector.multi_reduction <maximumf>, %51, %cst_19 [2] : vector<1x8x8xf32> to vector<1x8xf32>
    %53 = vector.shape_cast %52 : vector<1x8xf32> to vector<1x8x1xf32>
    %54 = vector.broadcast %53 : vector<1x8x1xf32> to vector<1x8x8xf32>
    %55 = arith.subf %51, %54 : vector<1x8x8xf32>
    %56 = math.exp %55 : vector<1x8x8xf32>
    %cst_20 = arith.constant dense<0.000000e+00> : vector<1x8xf32>
    %57 = vector.multi_reduction <add>, %56, %cst_20 [2] : vector<1x8x8xf32> to vector<1x8xf32>
    %58 = vector.shape_cast %57 : vector<1x8xf32> to vector<1x8x1xf32>
    %59 = tpu.reciprocal %58 {approx = true} : vector<1x8x1xf32> -> vector<1x8x1xf32>
    %60 = vector.broadcast %59 : vector<1x8x1xf32> to vector<1x8x8xf32>
    %61 = arith.mulf %56, %60 : vector<1x8x8xf32>
    %62 = arith.truncf %61 : vector<1x8x8xf32> to vector<1x8x8xbf16>
    "tpu.trace_start"() <{level = 10 : i32, message = "bqk,bkd->bqd"}> : () -> ()
    %cst_21 = arith.constant dense<0.000000e+00> : vector<1x8x32xf32>
    %63 = tpu.matmul %62, %48, %cst_21 {dimension_numbers = #tpu.dot_dimension_numbers<[2], [1], [1], [2], [0, 0, 0, 1, 1, 2], [0], [0]>} : vector<1x8x8xbf16>, vector<1x8x32xbf16>, vector<1x8x32xf32> -> vector<1x8x32xf32>
    "tpu.trace_stop"() : () -> ()
    %64 = vector.shape_cast %63 : vector<1x8x32xf32> to vector<8x32xf32>
    %c0_22 = arith.constant 0 : index
    %c32 = arith.constant 32 : index
    %65 = vector.load %arg18[%c0_22, %c32] : memref<8x128xf32, #tpu.memory_space<vmem>>, vector<8x32xf32>
    tpu.vector_store %arg18[%c0_22, %c32], %64 {strides = array<i32>} : memref<8x128xf32, #tpu.memory_space<vmem>>, vector<8x32xf32>,
    %66 = vector.extract_strided_slice %14 {offsets = [0, 0, 64], sizes = [1, 8, 32], strides = [1, 1, 1]} : vector<1x8x128xf32> to vector<1x8x32xf32>
    %67 = arith.truncf %66 : vector<1x8x32xf32> to vector<1x8x32xbf16>
    %68 = vector.extract_strided_slice %16 {offsets = [0, 0, 64], sizes = [1, 8, 32], strides = [1, 1, 1]} : vector<1x8x128xf32> to vector<1x8x32xf32>
    %69 = arith.truncf %68 : vector<1x8x32xf32> to vector<1x8x32xbf16>
    %70 = vector.extract_strided_slice %18 {offsets = [0, 0, 64], sizes = [1, 8, 32], strides = [1, 1, 1]} : vector<1x8x128xf32> to vector<1x8x32xf32>
    %71 = arith.truncf %70 : vector<1x8x32xf32> to vector<1x8x32xbf16>
    "tpu.trace_start"() <{level = 10 : i32, message = "bqd,bkd->bqk"}> : () -> ()
    %cst_23 = arith.constant dense<0.000000e+00> : vector<1x8x8xf32>
    %72 = tpu.matmul %67, %69, %cst_23 {dimension_numbers = #tpu.dot_dimension_numbers<[2], [2], [1], [1], [0, 0, 0, 1, 1, 1], [0], [0]>} : vector<1x8x32xbf16>, vector<1x8x32xbf16>, vector<1x8x8xf32> -> vector<1x8x8xf32>
    "tpu.trace_stop"() : () -> ()
    %73 = vector.broadcast %19 : vector<1x1x8xf32> to vector<1x8x8xf32>
    %74 = arith.addf %72, %73 : vector<1x8x8xf32>
    %cst_24 = arith.constant dense<0xFF800000> : vector<1x8xf32>
    %75 = vector.multi_reduction <maximumf>, %74, %cst_24 [2] : vector<1x8x8xf32> to vector<1x8xf32>
    %76 = vector.shape_cast %75 : vector<1x8xf32> to vector<1x8x1xf32>
    %77 = vector.broadcast %76 : vector<1x8x1xf32> to vector<1x8x8xf32>
    %78 = arith.subf %74, %77 : vector<1x8x8xf32>
    %79 = math.exp %78 : vector<1x8x8xf32>
    %cst_25 = arith.constant dense<0.000000e+00> : vector<1x8xf32>
    %80 = vector.multi_reduction <add>, %79, %cst_25 [2] : vector<1x8x8xf32> to vector<1x8xf32>
    %81 = vector.shape_cast %80 : vector<1x8xf32> to vector<1x8x1xf32>
    %82 = tpu.reciprocal %81 {approx = true} : vector<1x8x1xf32> -> vector<1x8x1xf32>
    %83 = vector.broadcast %82 : vector<1x8x1xf32> to vector<1x8x8xf32>
    %84 = arith.mulf %79, %83 : vector<1x8x8xf32>
    %85 = arith.truncf %84 : vector<1x8x8xf32> to vector<1x8x8xbf16>
    "tpu.trace_start"() <{level = 10 : i32, message = "bqk,bkd->bqd"}> : () -> ()
    %cst_26 = arith.constant dense<0.000000e+00> : vector<1x8x32xf32>
    %86 = tpu.matmul %85, %71, %cst_26 {dimension_numbers = #tpu.dot_dimension_numbers<[2], [1], [1], [2], [0, 0, 0, 1, 1, 2], [0], [0]>} : vector<1x8x8xbf16>, vector<1x8x32xbf16>, vector<1x8x32xf32> -> vector<1x8x32xf32>
    "tpu.trace_stop"() : () -> ()
    %87 = vector.shape_cast %86 : vector<1x8x32xf32> to vector<8x32xf32>
    %c0_27 = arith.constant 0 : index
    %c64 = arith.constant 64 : index
    %88 = vector.load %arg18[%c0_27, %c64] : memref<8x128xf32, #tpu.memory_space<vmem>>, vector<8x32xf32>
    tpu.vector_store %arg18[%c0_27, %c64], %87 {strides = array<i32>} : memref<8x128xf32, #tpu.memory_space<vmem>>, vector<8x32xf32>,
    %89 = vector.extract_strided_slice %14 {offsets = [0, 0, 96], sizes = [1, 8, 32], strides = [1, 1, 1]} : vector<1x8x128xf32> to vector<1x8x32xf32>
    %90 = arith.truncf %89 : vector<1x8x32xf32> to vector<1x8x32xbf16>
    %91 = vector.extract_strided_slice %16 {offsets = [0, 0, 96], sizes = [1, 8, 32], strides = [1, 1, 1]} : vector<1x8x128xf32> to vector<1x8x32xf32>
    %92 = arith.truncf %91 : vector<1x8x32xf32> to vector<1x8x32xbf16>
    %93 = vector.extract_strided_slice %18 {offsets = [0, 0, 96], sizes = [1, 8, 32], strides = [1, 1, 1]} : vector<1x8x128xf32> to vector<1x8x32xf32>
    %94 = arith.truncf %93 : vector<1x8x32xf32> to vector<1x8x32xbf16>
    "tpu.trace_start"() <{level = 10 : i32, message = "bqd,bkd->bqk"}> : () -> ()
    %cst_28 = arith.constant dense<0.000000e+00> : vector<1x8x8xf32>
    %95 = tpu.matmul %90, %92, %cst_28 {dimension_numbers = #tpu.dot_dimension_numbers<[2], [2], [1], [1], [0, 0, 0, 1, 1, 1], [0], [0]>} : vector<1x8x32xbf16>, vector<1x8x32xbf16>, vector<1x8x8xf32> -> vector<1x8x8xf32>
    "tpu.trace_stop"() : () -> ()
    %96 = vector.broadcast %19 : vector<1x1x8xf32> to vector<1x8x8xf32>
    %97 = arith.addf %95, %96 : vector<1x8x8xf32>
    %cst_29 = arith.constant dense<0xFF800000> : vector<1x8xf32>
    %98 = vector.multi_reduction <maximumf>, %97, %cst_29 [2] : vector<1x8x8xf32> to vector<1x8xf32>
    %99 = vector.shape_cast %98 : vector<1x8xf32> to vector<1x8x1xf32>
    %100 = vector.broadcast %99 : vector<1x8x1xf32> to vector<1x8x8xf32>
    %101 = arith.subf %97, %100 : vector<1x8x8xf32>
    %102 = math.exp %101 : vector<1x8x8xf32>
    %cst_30 = arith.constant dense<0.000000e+00> : vector<1x8xf32>
    %103 = vector.multi_reduction <add>, %102, %cst_30 [2] : vector<1x8x8xf32> to vector<1x8xf32>
    %104 = vector.shape_cast %103 : vector<1x8xf32> to vector<1x8x1xf32>
    %105 = tpu.reciprocal %104 {approx = true} : vector<1x8x1xf32> -> vector<1x8x1xf32>
    %106 = vector.broadcast %105 : vector<1x8x1xf32> to vector<1x8x8xf32>
    %107 = arith.mulf %102, %106 : vector<1x8x8xf32>
    %108 = arith.truncf %107 : vector<1x8x8xf32> to vector<1x8x8xbf16>
    "tpu.trace_start"() <{level = 10 : i32, message = "bqk,bkd->bqd"}> : () -> ()
    %cst_31 = arith.constant dense<0.000000e+00> : vector<1x8x32xf32>
    %109 = tpu.matmul %108, %94, %cst_31 {dimension_numbers = #tpu.dot_dimension_numbers<[2], [1], [1], [2], [0, 0, 0, 1, 1, 2], [0], [0]>} : vector<1x8x8xbf16>, vector<1x8x32xbf16>, vector<1x8x32xf32> -> vector<1x8x32xf32>
    "tpu.trace_stop"() : () -> ()
    %110 = vector.shape_cast %109 : vector<1x8x32xf32> to vector<8x32xf32>
    %c0_32 = arith.constant 0 : index
    %c96 = arith.constant 96 : index
    %111 = vector.load %arg18[%c0_32, %c96] : memref<8x128xf32, #tpu.memory_space<vmem>>, vector<8x32xf32>
    tpu.vector_store %arg18[%c0_32, %c96], %110 {strides = array<i32>} : memref<8x128xf32, #tpu.memory_space<vmem>>, vector<8x32xf32>,
    %c0_33 = arith.constant 0 : index
    %c0_34 = arith.constant 0 : index
    %112 = vector.load %arg18[%c0_33, %c0_34] : memref<8x128xf32, #tpu.memory_space<vmem>>, vector<8x128xf32>
    %113 = arith.truncf %112 : vector<8x128xf32> to vector<8x128xbf16>
    %c0_35 = arith.constant 0 : index
    %c0_36 = arith.constant 0 : index
    %c0_37 = arith.constant 0 : index
    %114 = vector.load %arg6[%c0_35, %c0_36, %c0_37] : memref<1x128x128xbf16, #tpu.memory_space<vmem>>, vector<1x128x128xbf16>
    %115 = vector.shape_cast %114 : vector<1x128x128xbf16> to vector<128x128xbf16>
    %cst_38 = arith.constant dense<0.000000e+00> : vector<8x128xf32>
    %116 = tpu.matmul %113, %115, %cst_38 {dimension_numbers = #tpu.dot_dimension_numbers<[1], [0], [0], [1], [0, 0, 1, 1], [], []>} : vector<8x128xbf16>, vector<128x128xbf16>, vector<8x128xf32> -> vector<8x128xf32>
    %c0_39 = arith.constant 0 : index
    %c0_40 = arith.constant 0 : index
    %c0_41 = arith.constant 0 : index
    %117 = vector.load %arg7[%c0_39, %c0_40, %c0_41] : memref<1x1x128xf32, #tpu.memory_space<vmem>>, vector<1x1x128xf32>
    %118 = vector.shape_cast %117 : vector<1x1x128xf32> to vector<1x128xf32>
    %119 = vector.broadcast %118 : vector<1x128xf32> to vector<8x128xf32>
    %120 = arith.addf %116, %119 : vector<8x128xf32>
    %121 = arith.addf %4, %120 : vector<8x128xf32>
    %c0_42 = arith.constant 0 : index
    %c0_43 = arith.constant 0 : index
    %c0_44 = arith.constant 0 : index
    %122 = vector.load %arg8[%c0_42, %c0_43, %c0_44] : memref<1x1x128xf32, #tpu.memory_space<vmem>>, vector<1x1x128xf32>
    %123 = vector.shape_cast %122 : vector<1x1x128xf32> to vector<1x128xf32>
    %c0_45 = arith.constant 0 : index
    %c0_46 = arith.constant 0 : index
    %c0_47 = arith.constant 0 : index
    %124 = vector.load %arg9[%c0_45, %c0_46, %c0_47] : memref<1x1x128xf32, #tpu.memory_space<vmem>>, vector<1x1x128xf32>
    %125 = vector.shape_cast %124 : vector<1x1x128xf32> to vector<1x128xf32>
    %cst_48 = arith.constant dense<0.000000e+00> : vector<8xf32>
    %126 = vector.multi_reduction <add>, %121, %cst_48 [1] : vector<8x128xf32> to vector<8xf32>
    %127 = vector.shape_cast %126 : vector<8xf32> to vector<8x1xf32>
    %cst_49 = arith.constant 1.280000e+02 : f32
    %128 = vector.broadcast %cst_49 : f32 to vector<8x1xf32>
    %129 = arith.divf %127, %128 : vector<8x1xf32>
    %130 = vector.broadcast %129 : vector<8x1xf32> to vector<8x128xf32>
    %131 = arith.subf %121, %130 : vector<8x128xf32>
    %132 = arith.mulf %131, %131 : vector<8x128xf32>
    %cst_50 = arith.constant dense<0.000000e+00> : vector<8xf32>
    %133 = vector.multi_reduction <add>, %132, %cst_50 [1] : vector<8x128xf32> to vector<8xf32>
    %134 = vector.shape_cast %133 : vector<8xf32> to vector<8x1xf32>
    %cst_51 = arith.constant 1.280000e+02 : f32
    %135 = vector.broadcast %cst_51 : f32 to vector<8x1xf32>
    %136 = arith.divf %134, %135 : vector<8x1xf32>
    %137 = vector.broadcast %129 : vector<8x1xf32> to vector<8x128xf32>
    %138 = arith.subf %121, %137 : vector<8x128xf32>
    %cst_52 = arith.constant 9.99999997E-7 : f32
    %139 = vector.broadcast %cst_52 : f32 to vector<8x1xf32>
    %140 = arith.addf %136, %139 : vector<8x1xf32>
    %141 = math.rsqrt %140 : vector<8x1xf32>
    %142 = vector.broadcast %141 : vector<8x1xf32> to vector<8x128xf32>
    %143 = arith.mulf %138, %142 : vector<8x128xf32>
    %144 = vector.broadcast %123 : vector<1x128xf32> to vector<8x128xf32>
    %145 = arith.mulf %143, %144 : vector<8x128xf32>
    %146 = vector.broadcast %125 : vector<1x128xf32> to vector<8x128xf32>
    %147 = arith.addf %145, %146 : vector<8x128xf32>
    %148 = arith.truncf %147 : vector<8x128xf32> to vector<8x128xbf16>
    %c0_53 = arith.constant 0 : index
    %c0_54 = arith.constant 0 : index
    %c0_55 = arith.constant 0 : index
    %149 = vector.load %arg10[%c0_53, %c0_54, %c0_55] : memref<1x128x256xbf16, #tpu.memory_space<vmem>>, vector<1x128x256xbf16>
    %150 = vector.shape_cast %149 : vector<1x128x256xbf16> to vector<128x256xbf16>
    %cst_56 = arith.constant dense<0.000000e+00> : vector<8x256xf32>
    %151 = tpu.matmul %148, %150, %cst_56 {dimension_numbers = #tpu.dot_dimension_numbers<[1], [0], [0], [1], [0, 0, 1, 1], [], []>} : vector<8x128xbf16>, vector<128x256xbf16>, vector<8x256xf32> -> vector<8x256xf32>
    %c0_57 = arith.constant 0 : index
    %c0_58 = arith.constant 0 : index
    %c0_59 = arith.constant 0 : index
    %152 = vector.load %arg11[%c0_57, %c0_58, %c0_59] : memref<1x1x256xf32, #tpu.memory_space<vmem>>, vector<1x1x256xf32>
    %153 = vector.shape_cast %152 : vector<1x1x256xf32> to vector<1x256xf32>
    %154 = vector.broadcast %153 : vector<1x256xf32> to vector<8x256xf32>
    %155 = arith.addf %151, %154 : vector<8x256xf32>
    %cst_60 = arith.constant 0.000000e+00 : f32
    %156 = vector.broadcast %cst_60 : f32 to vector<8x256xf32>
    %157 = arith.maximumf %155, %156 : vector<8x256xf32>
    %158 = arith.truncf %157 : vector<8x256xf32> to vector<8x256xbf16>
    %c0_61 = arith.constant 0 : index
    %c0_62 = arith.constant 0 : index
    %c0_63 = arith.constant 0 : index
    %159 = vector.load %arg12[%c0_61, %c0_62, %c0_63] : memref<1x256x128xbf16, #tpu.memory_space<vmem>>, vector<1x256x128xbf16>
    %160 = vector.shape_cast %159 : vector<1x256x128xbf16> to vector<256x128xbf16>
    %cst_64 = arith.constant dense<0.000000e+00> : vector<8x128xf32>
    %161 = tpu.matmul %158, %160, %cst_64 {dimension_numbers = #tpu.dot_dimension_numbers<[1], [0], [0], [1], [0, 0, 1, 1], [], []>} : vector<8x256xbf16>, vector<256x128xbf16>, vector<8x128xf32> -> vector<8x128xf32>
    %c0_65 = arith.constant 0 : index
    %c0_66 = arith.constant 0 : index
    %c0_67 = arith.constant 0 : index
    %162 = vector.load %arg13[%c0_65, %c0_66, %c0_67] : memref<1x1x128xf32, #tpu.memory_space<vmem>>, vector<1x1x128xf32>
    %163 = vector.shape_cast %162 : vector<1x1x128xf32> to vector<1x128xf32>
    %164 = vector.broadcast %163 : vector<1x128xf32> to vector<8x128xf32>
    %165 = arith.addf %161, %164 : vector<8x128xf32>
    %166 = arith.addf %147, %165 : vector<8x128xf32>
    %c0_68 = arith.constant 0 : index
    %c0_69 = arith.constant 0 : index
    %c0_70 = arith.constant 0 : index
    %167 = vector.load %arg14[%c0_68, %c0_69, %c0_70] : memref<1x1x128xf32, #tpu.memory_space<vmem>>, vector<1x1x128xf32>
    %168 = vector.shape_cast %167 : vector<1x1x128xf32> to vector<1x128xf32>
    %c0_71 = arith.constant 0 : index
    %c0_72 = arith.constant 0 : index
    %c0_73 = arith.constant 0 : index
    %169 = vector.load %arg15[%c0_71, %c0_72, %c0_73] : memref<1x1x128xf32, #tpu.memory_space<vmem>>, vector<1x1x128xf32>
    %170 = vector.shape_cast %169 : vector<1x1x128xf32> to vector<1x128xf32>
    %cst_74 = arith.constant dense<0.000000e+00> : vector<8xf32>
    %171 = vector.multi_reduction <add>, %166, %cst_74 [1] : vector<8x128xf32> to vector<8xf32>
    %172 = vector.shape_cast %171 : vector<8xf32> to vector<8x1xf32>
    %cst_75 = arith.constant 1.280000e+02 : f32
    %173 = vector.broadcast %cst_75 : f32 to vector<8x1xf32>
    %174 = arith.divf %172, %173 : vector<8x1xf32>
    %175 = vector.broadcast %174 : vector<8x1xf32> to vector<8x128xf32>
    %176 = arith.subf %166, %175 : vector<8x128xf32>
    %177 = arith.mulf %176, %176 : vector<8x128xf32>
    %cst_76 = arith.constant dense<0.000000e+00> : vector<8xf32>
    %178 = vector.multi_reduction <add>, %177, %cst_76 [1] : vector<8x128xf32> to vector<8xf32>
    %179 = vector.shape_cast %178 : vector<8xf32> to vector<8x1xf32>
    %cst_77 = arith.constant 1.280000e+02 : f32
    %180 = vector.broadcast %cst_77 : f32 to vector<8x1xf32>
    %181 = arith.divf %179, %180 : vector<8x1xf32>
    %182 = vector.broadcast %174 : vector<8x1xf32> to vector<8x128xf32>
    %183 = arith.subf %166, %182 : vector<8x128xf32>
    %cst_78 = arith.constant 9.99999997E-7 : f32
    %184 = vector.broadcast %cst_78 : f32 to vector<8x1xf32>
    %185 = arith.addf %181, %184 : vector<8x1xf32>
    %186 = math.rsqrt %185 : vector<8x1xf32>
    %187 = vector.broadcast %186 : vector<8x1xf32> to vector<8x128xf32>
    %188 = arith.mulf %183, %187 : vector<8x128xf32>
    %189 = vector.broadcast %168 : vector<1x128xf32> to vector<8x128xf32>
    %190 = arith.mulf %188, %189 : vector<8x128xf32>
    %191 = vector.broadcast %170 : vector<1x128xf32> to vector<8x128xf32>
    %192 = arith.addf %190, %191 : vector<8x128xf32>
    %193 = vector.shape_cast %192 : vector<8x128xf32> to vector<1x8x128xf32>
    %c0_79 = arith.constant 0 : index
    %c0_80 = arith.constant 0 : index
    %c0_81 = arith.constant 0 : index
    %194 = vector.load %arg17[%c0_79, %c0_80, %c0_81] : memref<1x8x128xf32, #tpu.memory_space<vmem>>, vector<1x8x128xf32>
    tpu.vector_store %arg17[%c0_79, %c0_80, %c0_81], %193 {strides = array<i32>} : memref<1x8x128xf32, #tpu.memory_space<vmem>>, vector<1x8x128xf32>,
    %c1_i32 = arith.constant 1 : i32
    %195 = arith.cmpi eq, %arg1, %c1_i32 : i32
    %196 = arith.extui %195 : i1 to i32
    %c0_i32_82 = arith.constant 0 : i32
    %197 = arith.cmpi ne, %196, %c0_i32_82 : i32
    scf.if %197 {
      %c0_83 = arith.constant 0 : index
      %c0_84 = arith.constant 0 : index
      %c0_85 = arith.constant 0 : index
      %198 = vector.load %arg16[%c0_83, %c0_84, %c0_85] : memref<1x8x128xf32, #tpu.memory_space<vmem>>, vector<1x8x128xf32>
      tpu.vector_store %arg16[%c0_83, %c0_84, %c0_85], %193 {strides = array<i32>} : memref<1x8x128xf32, #tpu.memory_space<vmem>>, vector<1x8x128xf32>,
    } else {
    }
    return
  }
  func.func @transform_0(%arg0: i32, %arg1: i32) -> (i32, i32, i32) {
    %c0_i32 = arith.constant 0 : i32
    %c0_i32_0 = arith.constant 0 : i32
    %c0_i32_1 = arith.constant 0 : i32
    return %arg0, %c0_i32, %c0_i32_0 : i32, i32, i32
  }
  func.func @transform_1(%arg0: i32, %arg1: i32) -> (i32, i32, i32) {
    %c0_i32 = arith.constant 0 : i32
    %c0_i32_0 = arith.constant 0 : i32
    %c0_i32_1 = arith.constant 0 : i32
    return %arg0, %c0_i32, %c0_i32_0 : i32, i32, i32
  }
  func.func @transform_2(%arg0: i32, %arg1: i32) -> (i32, i32, i32) {
    %c0_i32 = arith.constant 0 : i32
    %c0_i32_0 = arith.constant 0 : i32
    %c0_i32_1 = arith.constant 0 : i32
    return %arg1, %c0_i32, %c0_i32_0 : i32, i32, i32
  }
  func.func @transform_3(%arg0: i32, %arg1: i32) -> (i32, i32, i32) {
    %c0_i32 = arith.constant 0 : i32
    %c0_i32_0 = arith.constant 0 : i32
    %c0_i32_1 = arith.constant 0 : i32
    return %arg1, %c0_i32, %c0_i32_0 : i32, i32, i32
  }
  func.func @transform_4(%arg0: i32, %arg1: i32) -> (i32, i32, i32) {
    %c0_i32 = arith.constant 0 : i32
    %c0_i32_0 = arith.constant 0 : i32
    %c0_i32_1 = arith.constant 0 : i32
    return %arg1, %c0_i32, %c0_i32_0 : i32, i32, i32
  }
  func.func @transform_5(%arg0: i32, %arg1: i32) -> (i32, i32, i32) {
    %c0_i32 = arith.constant 0 : i32
    %c0_i32_0 = arith.constant 0 : i32
    %c0_i32_1 = arith.constant 0 : i32
    return %arg1, %c0_i32, %c0_i32_0 : i32, i32, i32
  }
  func.func @transform_6(%arg0: i32, %arg1: i32) -> (i32, i32, i32) {
    %c0_i32 = arith.constant 0 : i32
    %c0_i32_0 = arith.constant 0 : i32
    %c0_i32_1 = arith.constant 0 : i32
    return %arg1, %c0_i32, %c0_i32_0 : i32, i32, i32
  }
  func.func @transform_7(%arg0: i32, %arg1: i32) -> (i32, i32, i32) {
    %c0_i32 = arith.constant 0 : i32
    %c0_i32_0 = arith.constant 0 : i32
    %c0_i32_1 = arith.constant 0 : i32
    return %arg1, %c0_i32, %c0_i32_0 : i32, i32, i32
  }
  func.func @transform_8(%arg0: i32, %arg1: i32) -> (i32, i32, i32) {
    %c0_i32 = arith.constant 0 : i32
    %c0_i32_0 = arith.constant 0 : i32
    %c0_i32_1 = arith.constant 0 : i32
    return %arg1, %c0_i32, %c0_i32_0 : i32, i32, i32
  }
  func.func @transform_9(%arg0: i32, %arg1: i32) -> (i32, i32, i32) {
    %c0_i32 = arith.constant 0 : i32
    %c0_i32_0 = arith.constant 0 : i32
    %c0_i32_1 = arith.constant 0 : i32
    return %arg1, %c0_i32, %c0_i32_0 : i32, i32, i32
  }
  func.func @transform_10(%arg0: i32, %arg1: i32) -> (i32, i32, i32) {
    %c0_i32 = arith.constant 0 : i32
    %c0_i32_0 = arith.constant 0 : i32
    %c0_i32_1 = arith.constant 0 : i32
    return %arg1, %c0_i32, %c0_i32_0 : i32, i32, i32
  }
  func.func @transform_11(%arg0: i32, %arg1: i32) -> (i32, i32, i32) {
    %c0_i32 = arith.constant 0 : i32
    %c0_i32_0 = arith.constant 0 : i32
    %c0_i32_1 = arith.constant 0 : i32
    return %arg1, %c0_i32, %c0_i32_0 : i32, i32, i32
  }
  func.func @transform_12(%arg0: i32, %arg1: i32) -> (i32, i32, i32) {
    %c0_i32 = arith.constant 0 : i32
    %c0_i32_0 = arith.constant 0 : i32
    %c0_i32_1 = arith.constant 0 : i32
    return %arg1, %c0_i32, %c0_i32_0 : i32, i32, i32
  }
  func.func @transform_13(%arg0: i32, %arg1: i32) -> (i32, i32, i32) {
    %c0_i32 = arith.constant 0 : i32
    %c0_i32_0 = arith.constant 0 : i32
    %c0_i32_1 = arith.constant 0 : i32
    return %arg1, %c0_i32, %c0_i32_0 : i32, i32, i32
  }
  func.func @transform_14(%arg0: i32, %arg1: i32) -> (i32, i32, i32) {
    %c0_i32 = arith.constant 0 : i32
    %c0_i32_0 = arith.constant 0 : i32
    %c0_i32_1 = arith.constant 0 : i32
    return %arg0, %c0_i32, %c0_i32_0 : i32, i32, i32
  }
}

</mosaic_0001>

<bundles_post_ra>
// kernel: tpu_custom_call.1
= control target key start
LH: loop header
LB: loop body
LE: loop exit
PB: predicated region body
PF: predicated region fallthrough
CT: control target
= control target key end

     0   :  { %s3719_s0 = inlined_call_operand.hbm [shape: f32[2,8,128], index: 0, kind: input, shape index: {}]   ;;  %s3720_s1 = inlined_call_operand.hbm [shape: f32[2,1,8], index: 1, kind: input, shape index: {}]   ;;  %s3721_s2 = inlined_call_operand.hbm [shape: bf16[2,128,384], index: 2, kind: input, shape index: {}]   ;;  %s3722_s3 = inlined_call_operand.hbm [shape: f32[2,1,384], index: 3, kind: input, shape index: {}]   ;;  %s3723_s4 = inlined_call_operand.hbm [shape: bf16[2,128,128], index: 4, kind: input, shape index: {}]   ;;  %s3724_s5 = inlined_call_operand.vmem [shape: f32[2,1,128], index: 5, kind: input, shape index: {}]   ;;  %s3725_s6 = inlined_call_operand.hbm [shape: f32[2,1,128], index: 6, kind: input, shape index: {}]   ;;  %s3726_s7 = inlined_call_operand.hbm [shape: f32[2,1,128], index: 7, kind: input, shape index: {}]   ;;  %s3727_s8 = inlined_call_operand.hbm [shape: bf16[2,128,256], index: 8, kind: input, shape index: {}]   ;;  %s3728_s9 = inlined_call_operand.vmem [shape: f32[2,1,256], index: 9, kind: input, shape index: {}]   ;;  %s3729_s10 = inlined_call_operand.hbm [shape: bf16[2,256,128], index: 10, kind: input, shape index: {}]   ;;  %s3730_s11 = inlined_call_operand.vmem [shape: f32[2,1,128], index: 11, kind: input, shape index: {}]   ;;  %s3731_s12 = inlined_call_operand.vmem [shape: f32[2,1,128], index: 12, kind: input, shape index: {}]   ;;  %s3732_s13 = inlined_call_operand.vmem [shape: f32[2,1,128], index: 13, kind: input, shape index: {}]   ;;  %s3733_s14 = inlined_call_operand.hbm [shape: f32[2,8,128], index: 14, kind: output, shape index: {}]  }
   0x1   :  { %3760 = sst [smem:[#allocation45_spill]] %s3719_s0 }
   0x2   :  { %3761 = sst [smem:[#allocation46_spill]] %s3720_s1 }
   0x3   :  { %3762 = sst [smem:[#allocation47_spill]] %s3721_s2 }
   0x4   :  { %3763 = sst [smem:[#allocation48_spill]] %s3722_s3 }
   0x5   :  { %3764 = sst [smem:[#allocation49_spill]] %s3723_s4 }
   0x6   :  { %3765 = sst [smem:[#allocation50_spill]] %s3724_s5 }
   0x7   :  { %3766 = sst [smem:[#allocation51_spill]] %s3725_s6 }
   0x8   :  { %3767 = sst [smem:[#allocation52_spill]] %s3726_s7 }
   0x9   :  { %3768 = sst [smem:[#allocation53_spill]] %s3727_s8 }
   0xa   :  { %3769 = sst [smem:[#allocation54_spill]] %s3728_s9 }
   0xb   :  { %3770 = sst [smem:[#allocation55_spill]] %s3729_s10 }
   0xc   :  { %3771 = sst [smem:[#allocation56_spill]] %s3730_s11 }
   0xd   :  { %3772 = sst [smem:[#allocation57_spill]] %s3731_s12 }
   0xe   :  { %3773 = sst [smem:[#allocation58_spill]] %s3732_s13 }
   0xf   :  { %3774 = sst [smem:[#allocation59_spill]] %s3733_s14 }
  0x10   :  { %19 = vsyncpa [#allocation5], 0 }
  0x11   :  { %21 = vsyncpa [#allocation5 + $0x1], 0 }
  0x12   :  { %22 = vsyncpa [#allocation8], 0 }
  0x13   :  { %24 = vsyncpa [#allocation8 + $0x1], 0 }
  0x14   :  { %25 = vsyncpa [#allocation11], 0 }
  0x15   :  { %27 = vsyncpa [#allocation11 + $0x1], 0 }
  0x16   :  { %28 = vsyncpa [#allocation14], 0 }
  0x17   :  { %30 = vsyncpa [#allocation14 + $0x1], 0 }
  0x18   :  { %31 = vsyncpa [#allocation17], 0 }
  0x19   :  { %33 = vsyncpa [#allocation17 + $0x1], 0 }
  0x1a   :  { %34 = vsyncpa [#allocation6], 0 }
  0x1b   :  { %36 = vsyncpa [#allocation6 + $0x1], 0  ;;  %s3142_s29 = smov 0   ;;  %s3144_s30 = smov 0  }
  0x1c   :  { %s3146_s15 = smov 0   ;;  %s3148_s16 = smov 0  }
  0x1d   :  { %s3150_s17 = smov 0   ;;  %s3152_s18 = smov 0  }
  0x1e   :  { %s3154_s19 = smov 0   ;;  %s3156_s20 = smov 0  }
  0x1f   :  { %s3158_s21 = smov 0   ;;  %s3160_s22 = smov 0  }
  0x20   :  { %s3162_s23 = smov 0  }
  0x21 LB: > { %3775 = sst [smem:[#allocation27_spill]] %s3019_s30  ;;  %s3198_s24 = sadd.s32 4294967295, %s3055_s23   ;;  %s3055_s23 = sphi %s3162_s23, %s42_s23   ;;  %s3051_s22 = sphi %s3160_s22, %s3851_s22   ;;  %s3047_s21 = sphi %s3158_s21, %s3850_s21   ;;  %s3043_s20 = sphi %s3156_s20, %s3849_s20   ;;  %s3039_s19 = sphi %s3154_s19, %s3848_s19   ;;  %s3035_s18 = sphi %s3152_s18, %s3847_s18   ;;  %s3031_s17 = sphi %s3150_s17, %s3853_s17   ;;  %s3027_s16 = sphi %s3148_s16, %s3852_s16   ;;  %s3023_s15 = sphi %s3146_s15, %s3845_s15   ;;  %s3019_s30 = sphi %s3144_s30, %s3844_s30   ;;  %s3015_s29 = sphi %s3142_s29, %s3843_s29  }
  0x22   : > { %3776 = sst [smem:[#allocation28_spill]] %s3023_s15  ;;  %s2097_s25 = sadd.s32 4294967294, %s3055_s23  }
  0x23   : > { %3777 = sst [smem:[#allocation29_spill]] %s3027_s16  ;;  %s51_s26 = sadd.s32 1, %s3047_s21 }
  0x24   : > { %3778 = sst [smem:[#allocation30_spill]] %s3035_s18  ;;  %s54_s27 = sadd.s32 1, %s3051_s22 }
  0x25   : > { %3779 = sst [smem:[#allocation31_spill]] %s3039_s19  ;;  %p52_p0 = scmp.ge.s32.totalorder %s51_s26, 2 }
  0x26   : > { %3780 = sst [smem:[#allocation32_spill]] %s3043_s20  ;;  %s61_s28 = sadd.s32 1, %s3035_s18 }
  0x27   : > { %3781 = sst [smem:[#allocation33_spill]] %s3047_s21  ;;  %p68_p1 = scmp.ne.s32.totalorder %s3035_s18, %s3031_s17 }
  0x28   : > { %3782 = sst [smem:[#allocation34_spill]] %s3051_s22  ;;  %p69_p2 = scmp.eq.s32.totalorder %s3055_s23, 0 }
  0x29   : > { %3783 = sst [smem:[#allocation35_spill]] %s3055_s23  ;;  %s3855_s26 = smov (%p52_p0, %s51_s26), 0 }
  0x2a   : > { %3784 = sst [smem:[#allocation36_spill]] %s3198_s24  ;;  %s3857_s27 = smov (!%p52_p0, %s54_s27), %s3051_s22 }
  0x2b   : > { %3785 = sst [smem:[#allocation37_spill]] %s3855_s26  ;;  %p3215_p3 = por %p69_p2, %p68_p1 }
  0x2c   : > { %p3737_p4 = scmp.ne.s32.totalorder %s3031_s17, %s3027_s16  ;;  %p56_p5 = scmp.ge.s32.totalorder %s3857_s27, 2 }
  0x2d   : > { %p75_p6 = scmp.eq.s32.totalorder %s3198_s24, 0  ;;  %s110_s20 = ssub.s32 %s3047_s21, %s3855_s26 }
  0x2e   : > { %s113_s13 = sadd.s32 1, %s3023_s15  ;;  %s3859_s27 = smov (%p56_p5, %s3857_s27), 0 }
  0x2f   : > { %3787 = sst [smem:[#allocation38_spill]] %s3859_s27  ;;  %p3232_p7 = por %p75_p6, %p3737_p4 }
  0x30   : > { %p111_p8 = scmp.eq.s32.totalorder %s110_s20, 0  ;;  %s58_s11 = ssub.s32 %s3051_s22, %s3859_s27 }
  0x31   : > { %s3788_s12 = scalar_select %p3232_p7, 1, 0 }
  0x32   : > { %p120_p9 = scmp.ne.s32.totalorder %s3023_s15, %s3019_s30  ;;  %p59_p10 = scmp.eq.s32.totalorder %s58_s11, 0 }
  0x33   : > { %3789 = sst [smem:[#allocation39_spill]] %s3788_s12  ;;  %p126_p11 = scmp.ne.s32.totalorder %s3019_s30, %s3015_s29 }
  0x34   : > { %s3243_s26 = scalar_select %p111_p8, %s3023_s15, %s113_s13  }
  0x35   : > { %s3246_s9 = scalar_select %p59_p10, %s3035_s18, %s61_s28  }
  0x36   : > { %3790 = sst [smem:[#allocation40_spill]] %s3243_s26  ;;  %p3250_p12 = por %p120_p9, %p69_p2 }
  0x37   : > { %3791 = sst [smem:[#allocation41_spill]] %s3246_s9  ;;  %p3256_p13 = por %p126_p11, %p75_p6 }
  0x38   : > { %p436_p0 = scmp.eq.s32.totalorder %s3198_s24, 3  ;;  %p442_p5 = scmp.eq.s32.totalorder %s2097_s25, 3 }
  0x39   : > { %s3793_s19 = scalar_select %p3256_p13, 1, 0 }
  0x3a   : > { %p2514_p4 = scmp.lt.s32.totalorder %s3055_s23, 4  ;;  %p3265_p8 = por %p436_p0, %p68_p1 }
  0x3b   : > { %3794 = sst [smem:[#allocation42_spill]] %s3793_s19  ;;  %p3797_p2 = scmp.ne.s32.totalorder %s3031_s17, %s3027_s16 }
  0x3c   : > { %s3795_s11 = scalar_select %p3265_p8, 1, 0 }
  0x3d   : > { %p3272_p9 = por %p442_p5, %p3797_p2  ;;  %s3277_s29 = sand.u32 1, %s3035_s18  }
  0x3e   : > { %3796 = sst [smem:[#allocation43_spill]] %s3795_s11  ;;  %p3281_p6 = pnand %p2514_p4, %p3215_p3 }
  0x3f   : > { %s3798_s13 = scalar_select %p3272_p9, 1, 0 }
  0x40   : > { %s3286_s25 = sand.u32 1, %s3055_s23   ;;  %s3801_s1 = sld [smem:[#allocation46_spill]] }
  0x41   : > { %3799 = sst [smem:[#allocation44_spill]] %s3798_s13  ;;  %s484_s26 = scalar_lea.vmem [#allocation7], %s3277_s29 }
  0x42   : > { %s491_s13 = sshll.u32 %s484_s26, 4  ;;  %p3295_p1 = pnand %p2514_p4, %p3250_p12  ;;  %s492_s13 = int_to_ptr.vmem [resolvable:$true] %s491_s13 }
  0x43   : > { %s3744_s16 = scalar_lea.sflag [#allocation8], %s3286_s25  ;;  %p2112_p3 = scmp.ge.s32.totalorder %s3055_s23, 1 }
  0x44   : > { %p668_p10 = scmp.lt.s32.totalorder %s3055_s23, 5  ;;  %s3307_s27 = sand.u32 1, %s3023_s15  }
  0x45   : > { %s2459_s26 = smul.u32 3, %s3047_s21  ;;  %s3804_s3 = sld [smem:[#allocation48_spill]] }
  0x46   : > { %s487_s9 = scalar_lea.hbm %s3801_s1, %s3051_s22  ;;  %p3310_p11 = pnand %p2112_p3, %p668_p10 }
  0x47   : > { %s489_s18 = sshll.u32 %s487_s9, 4  ;;  %s2458_s9 = smul.u32 3, %s3307_s27  ;;  %s490_s18 = int_to_ptr.hbm [resolvable:$true] %s489_s18 }
  0x48   : > { %2488 = dma.hbm_to_vmem [thread:$0]  (!%p3281_p6), %s490_s18, 16, %s492_s13, %s3744_s16  }
  0x49   : > { %s524_s18 = scalar_lea.vmem [#allocation10], %s2458_s9  ;;  %s3752_s15 = scalar_lea.sflag [#allocation11], %s3286_s25 }
  0x4a   : > { %s532_s13 = sshll.u32 %s524_s18, 4  ;;  %s3805_s6 = sld [smem:[#allocation51_spill]]  ;;  %s533_s13 = int_to_ptr.vmem [resolvable:$true] %s532_s13 }
  0x4b   : > { %s528_s11 = scalar_lea.hbm %s3804_s3, %s2459_s26  ;;  %s570_s1 = scalar_lea.vmem [#allocation13], %s3307_s27 }
  0x4c   : > { %s530_s16 = sshll.u32 %s528_s11, 4  ;;  %s577_s28 = sshll.u32 %s570_s1, 4  ;;  %s531_s16 = int_to_ptr.hbm [resolvable:$true] %s530_s16  ;;  %s578_s28 = int_to_ptr.vmem [resolvable:$true] %s577_s28 }
  0x4d   : > { %2494 = dma.hbm_to_vmem [thread:$0]  (!%p3295_p1), %s531_s16, 48, %s533_s13, %s3752_s15  }
  0x4e   : > { %s3753_s9 = scalar_lea.sflag [#allocation14], %s3286_s25  ;;  %s2106_s11 = sshll.u32 %s3307_s27, 7 }
  0x4f   : > { %s2390_s26 = sshll.u32 %s3047_s21, 7  ;;  %s3806_s8 = sld [smem:[#allocation53_spill]] }
  0x50   : > { %s573_s30 = scalar_lea.hbm %s3805_s6, %s3047_s21  ;;  %s605_s23 = scalar_lea.vmem [#allocation16], %s2106_s11 }
  0x51   : > { %s575_s24 = sshll.u32 %s573_s30, 4  ;;  %s613_s1 = sshll.u32 %s605_s23, 4  ;;  %s576_s24 = int_to_ptr.hbm [resolvable:$true] %s575_s24  ;;  %s614_s1 = int_to_ptr.vmem [resolvable:$true] %s613_s1 }
  0x52   : > { %2500 = dma.hbm_to_vmem [thread:$0]  (!%p3295_p1), %s576_s24, 16, %s578_s28, %s3753_s9  }
  0x53   : > { %s3756_s30 = scalar_lea.sflag [#allocation17], %s3286_s25  ;;  %s3057_s15 = smov 128  }
  0x54   : > { %s3058_s3 = smov 8   ;;  %s3807_s10 = sld [smem:[#allocation55_spill]] }
  0x55   : > { %s610_s13 = scalar_lea.hbm %s3806_s8, %s2390_s26  ;;  %s2100_s23 = sshll.u32 %s3277_s29, 3 }
  0x56   : > { %s611_s19 = sshll.u32 %s610_s13, 4  ;;  %s634_s13 = scalar_lea.vmem [#allocation18], %s2106_s11  ;;  %s612_s19 = int_to_ptr.hbm [resolvable:$true] %s611_s19 }
  0x57   : > { %2506 = dma.hbm_to_vmem [thread:$0]  (!%p3295_p1), %s612_s19, 2048, %s614_s1, %s3756_s30, %s3057_s15, %s3057_s15, %s3058_s3  }
  0x58   : > { %s642_s9 = sshll.u32 %s634_s13, 4  ;;  %s2101_s6 = sshll.u32 %s3051_s22, 3  ;;  %s3348_s9 = int_to_ptr.vmem [resolvable:$true] %s642_s9 }
  0x59   : > { %s3808_s0 = sld [smem:[#allocation45_spill]]  ;;  %s466_s15 = scalar_lea.vmem [#allocation4], %s2100_s23 }
  0x5a   : > { %s639_s18 = scalar_lea.hbm %s3807_s10, %s2390_s26  ;;  %s474_s19 = sshll.u32 %s466_s15, 4  ;;  %s475_s19 = int_to_ptr.vmem [resolvable:$true] %s474_s19 }
  0x5b   : > { %s640_s16 = sshll.u32 %s639_s18, 4  ;;  %s2456_s11 = smul.u32 192, %s3307_s27  ;;  %s3346_s16 = int_to_ptr.hbm [resolvable:$true] %s640_s16 }
  0x5c   : > { %s463_s26 = scalar_lea.sflag [#allocation5], %s3277_s29  ;;  %s2457_s24 = smul.u32 192, %s3047_s21 }
  0x5d   : > { %s502_s28 = scalar_lea.vmem [#allocation9], %s2456_s11  ;;  %s3809_s2 = sld [smem:[#allocation47_spill]] }
  0x5e   : > { %s510_s18 = sshll.u32 %s502_s28, 4  ;;  %s2103_s12 = sshll.u32 %s3307_s27, 6  ;;  %s511_s18 = int_to_ptr.vmem [resolvable:$true] %s510_s18 }
  0x5f   : > { %s470_s3 = scalar_lea.hbm %s3808_s0, %s2101_s6  ;;  %s3059_s23 = smov 192  }
  0x60   : > { %s472_s1 = sshll.u32 %s470_s3, 4  ;;  %s3060_s3 = smov 12   ;;  %s473_s1 = int_to_ptr.hbm [resolvable:$true] %s472_s1 }
  0x61   : > { %2485 = dma.hbm_to_vmem [thread:$0]  (!%p3281_p6), %s473_s1, 128, %s475_s19, %s463_s26  }
  0x62   : > { %s3810_s29 = scalar_lea.sflag [#allocation8], %s3286_s25  ;;  %s2389_s20 = sshll.u32 %s3047_s21, 6 }
  0x63   : > { %s507_s6 = scalar_lea.hbm %s3809_s2, %s2457_s24  ;;  %s3811_s4 = sld [smem:[#allocation49_spill]] }
  0x64   : > { %s508_s8 = sshll.u32 %s507_s6, 4  ;;  %s543_s1 = scalar_lea.vmem [#allocation12], %s2103_s12  ;;  %s509_s8 = int_to_ptr.hbm [resolvable:$true] %s508_s8 }
  0x65   : > { %2491 = dma.hbm_to_vmem [thread:$0]  (!%p3295_p1), %s509_s8, 3072, %s511_s18, %s3810_s29, %s3059_s23, %s3059_s23, %s3060_s3  }
  0x66   : > { %s551_s11 = sshll.u32 %s543_s1, 4  ;;  %s3061_s24 = smov 64   ;;  %s552_s11 = int_to_ptr.vmem [resolvable:$true] %s551_s11 }
  0x67   : > { %s3062_s28 = smov 4   ;;  %s3812_s18 = scalar_lea.sflag [#allocation11], %s3286_s25 }
  0x68   : > { %s3813_s7 = sld [smem:[#allocation52_spill]]  ;;  %s587_s23 = scalar_lea.vmem [#allocation15], %s3307_s27 }
  0x69   : > { %s548_s30 = scalar_lea.hbm %s3811_s4, %s2389_s20  ;;  %s594_s3 = sshll.u32 %s587_s23, 4  ;;  %s595_s3 = int_to_ptr.vmem [resolvable:$true] %s594_s3 }
  0x6a   : > { %s549_s26 = sshll.u32 %s548_s30, 4  ;;  %s3814_s12 = scalar_lea.sflag [#allocation14], %s3286_s25  ;;  %s550_s26 = int_to_ptr.hbm [resolvable:$true] %s549_s26 }
  0x6b   : > { %2497 = dma.hbm_to_vmem [thread:$0]  (!%p3295_p1), %s550_s26, 1024, %s552_s11, %s3812_s18, %s3061_s24, %s3061_s24, %s3062_s28  }
  0x6c   : > { %s3815_s20 = scalar_lea.sflag [#allocation17], %s3286_s25  ;;  %672 = sbr.rel (%p3310_p11) target bundleno = 2371 (0x943), region = 76 }
  0x6d   : > { %2509 = dma.hbm_to_vmem [thread:$0]  (!%p3295_p1), %s3346_s16, 2048, %s3348_s9, %s3815_s20, %s3061_s24, %s3061_s24, %s3062_s28  }
  0x6e   : > { %s590_s8 = scalar_lea.hbm %s3813_s7, %s3047_s21  ;;  %s3394_s19 = sand.u32 (!%p3310_p11), 1, %s3031_s17  }
  0x6f   : > { %s592_s29 = sshll.u32 %s590_s8, 4  ;;  %s3757_s27 = sshll.u32 (!%p3310_p11), %s3394_s19, 3  ;;  %s593_s29 = int_to_ptr.hbm [resolvable:$true] %s592_s29 }
  0x70   : > { %2503 = dma.hbm_to_vmem [thread:$0]  (!%p3295_p1), %s593_s29, 16, %s595_s3, %s3814_s12  }
  0x71   : > { %s675_s30 = scalar_lea.sflag [#allocation5], %s3394_s19  ;;  %s3400_s1 = scalar_lea.vmem [#allocation4], %s3757_s27 }
  0x72   : > { %2986 = dma.done.wait (%p3232_p7), %s675_s30, 128  }
  0x73   : > { %2988 = vsyncadd (%p3232_p7), %s675_s30, 4294967168  ;;  %s3817_s25 = sld [smem:[#allocation36_spill]] }
  0x79   : > { %s684_s14 = sand.u32 1, %s3817_s25  }
  0x7a   : > { %s685_s5 = scalar_lea.sflag [#allocation8], %s684_s14 }
  0x7b   : > { %2990 = dma.done.wait (%p3232_p7), %s685_s5, 16  }
  0x7c   : > { %2992 = vsyncadd (%p3232_p7), %s685_s5, 4294967280  ;;  %s3818_s16 = sld [smem:[#allocation27_spill]] }
  0x82   : > { %s3413_s26 = sand.u32 1, %s3818_s16  }
  0x83   : > { %s2460_s24 = smul.u32 192, %s3413_s26 }
  0x85   : > { %s3416_s28 = scalar_lea.vmem [#allocation9], %s2460_s24 }
  0x86   : > { %2994 = dma.done.wait (%p3256_p13), %s685_s5, 3072  }
  0x87   : > { %2996 = vsyncadd (%p3256_p13), %s685_s5, 4294964224  ;;  %s2461_s18 = smul.u32 3, %s3413_s26  ;;  %s704_s13 = scalar_lea.sflag [#allocation11], %s684_s14 }
  0x89   : > { %s3423_s6 = scalar_lea.vmem [#allocation10], %s2461_s18 }
  0x8a   : > { %2998 = dma.done.wait (%p3256_p13), %s704_s13, 1072  }
  0x8b   : > { %3000 = vsyncadd (%p3256_p13), %s704_s13, 4294966224  ;;  %s2114_s8 = sshll.u32 %s3413_s26, 6  ;;  %s724_s3 = scalar_lea.sflag [#allocation14], %s684_s14 }
  0x8c   : > { %s3430_s23 = scalar_lea.vmem [#allocation12], %s2114_s8 }
  0x8d   : > { %3002 = dma.done.wait (%p3256_p13), %s724_s3, 32  }
  0x8e   : > { %3004 = vsyncadd (%p3256_p13), %s724_s3, 4294967264  ;;  %s2115_s12 = sshll.u32 %s3413_s26, 7  ;;  %s742_s15 = scalar_lea.sflag [#allocation17], %s684_s14 }
  0x8f   : > { %s3439_s30 = scalar_lea.vmem [#allocation16], %s2115_s12 }
  0x90   : > { %3006 = dma.done.wait (%p3256_p13), %s742_s15, 4096  }
  0x91   : > { %3008 = vsyncadd (%p3256_p13), %s742_s15, 4294963200  ;;  %s3820_s25 = sld [smem:[#allocation31_spill]]  ;;  %s3471_s21 = scalar_lea.vmem [#allocation18], %s2115_s12 }
  0x92   : > { %s3822_s11 = sld [smem:[#allocation54_spill]]  ;;  %s3826_s18 = sshll.u32 %s3394_s19, 3 }
  0x93   : > { %s3823_s9 = sld [smem:[#allocation56_spill]]  ;;  %s3475_s14 = scalar_lea.vmem [#allocation19], %s3826_s18 }
  0x94   : > { %s3824_s4 = sld [smem:[#allocation57_spill]] }
  0x95   : > { %s3825_s10 = sld [smem:[#allocation58_spill]] }
  0x97   : > { %p854_p4 = scmp.lt.s32.totalorder %s3820_s25, 1  ;;  %p2119_p7 = scmp.ne.s32.totalorder %s3820_s25, 0 }
  0x99   : > { %s3447_s5 = scalar_select %p854_p4, %s3820_s25, 1 }
  0x9a   : > { %874 = sbr.rel (%p2119_p7) target bundleno = 161 (0xa1), region = 116 }
  0x9b   : > { %s2118_s13 = sshll.u32 %s3447_s5, 1  ;;  %s863_s27 = scalar_lea.vmem %s3823_s9, %s3447_s5 }
  0x9c   : > { %s3457_s15 = scalar_lea.vmem %s3822_s11, %s2118_s13  ;;  %s866_s7 = scalar_lea.vmem %s3824_s4, %s3447_s5 }
  0x9d   : > { %s869_s22 = scalar_lea.vmem %s3825_s10, %s3447_s5 }
  0x9f   : > { %v875_v0 = vld [vmem:[%s3400_s1] sm:$0xff] }
  0xa0   : > { %876 = vst [vmem:[#allocation2] sm:$0xff] %v875_v0 }
  0xa1 PF: > { %v2206_v1 = vld [vmem:[%s3416_s28 + $0xa8] sm:$0xf]  ;;  %v2414_v2 = vld [vmem:[%s3416_s28 + $0xb0] sm:$0xf0]  ;;  %v2413_v3 = vld [vmem:[%s3416_s28 + $0xac] sm:$0xf] }
  0xa2   : > { %v2207_v4 = vor.u32 %v2414_v2, %v2206_v1  ;;  %v2208_v5 = vld [vmem:[%s3416_s28 + $0xb4] sm:$0xf0]  ;;  %v2194_v6 = vld [vmem:[%s3416_s28 + $0x90] sm:$0xf]  ;;  %v2411_v7 = vld [vmem:[%s3416_s28 + $0x98] sm:$0xf0] }
  0xa3   : > { %v2211_v8 = vor.u32 %v2413_v3, %v2208_v5  ;;  %v2410_v9 = vld [vmem:[%s3416_s28 + $0x94] sm:$0xf]  ;;  %v2196_v10 = vld [vmem:[%s3416_s28 + $0x9c] sm:$0xf0]  ;;  %v2195_v11 = vor.u32 %v2411_v7, %v2194_v6  ;;  %v2182_v13 = vld [vmem:[%s3416_s28 + $0x78] sm:$0xf] }
  0xa4   : > { %1047 = vmatpush.bf16.msra.mxu0 %v2207_v4  ;;  %v2199_v12 = vor.u32 %v2410_v9, %v2196_v10  ;;  %v2408_v14 = vld [vmem:[%s3416_s28 + $0x80] sm:$0xf0]  ;;  %v2407_v15 = vld [vmem:[%s3416_s28 + $0x7c] sm:$0xf]  ;;  %v2184_v16 = vld [vmem:[%s3416_s28 + $0x84] sm:$0xf0] }
  0xa5   : > { %1060 = vmatpush.bf16.msra.mxu1 %v2211_v8  ;;  %v2183_v17 = vor.u32 %v2408_v14, %v2182_v13  ;;  %v2187_v18 = vor.u32 %v2407_v15, %v2184_v16  ;;  %v2170_v19 = vld [vmem:[%s3416_s28 + $0x60] sm:$0xf]  ;;  %v2405_v20 = vld [vmem:[%s3416_s28 + $0x68] sm:$0xf0]  ;;  %v2404_v21 = vld [vmem:[%s3416_s28 + $0x64] sm:$0xf] }
  0xa6   : > { %v2172_v22 = vld [vmem:[%s3416_s28 + $0x6c] sm:$0xf0]  ;;  %v2171_v23 = vor.u32 %v2405_v20, %v2170_v19  ;;  %v2415_v25 = vld [vmem:[%s3416_s28 + $0xb8] sm:$0xf0]  ;;  %v2202_v26 = vld [vmem:[%s3416_s28 + $0x98] sm:$0xf] }
  0xa7   : > { %v2214_v24 = vld [vmem:[%s3416_s28 + $0xb0] sm:$0xf]  ;;  %v2175_v27 = vor.u32 %v2404_v21, %v2172_v22  ;;  %v2158_v28 = vld [vmem:[%s3416_s28 + $0x48] sm:$0xf]  ;;  %v2402_v29 = vld [vmem:[%s3416_s28 + $0x50] sm:$0xf0] }
  0xa8   : > { %1048 = vmatpush.bf16.msra.mxu0 %v2195_v11  ;;  %v2215_v30 = vor.u32 %v2415_v25, %v2214_v24  ;;  %v2412_v31 = vld [vmem:[%s3416_s28 + $0xa0] sm:$0xf0]  ;;  %v2401_v32 = vld [vmem:[%s3416_s28 + $0x4c] sm:$0xf]  ;;  %v2160_v33 = vld [vmem:[%s3416_s28 + $0x54] sm:$0xf0]  ;;  %v2159_v35 = vor.u32 %v2402_v29, %v2158_v28 }
  0xa9   : > { %1061 = vmatpush.bf16.msra.mxu1 %v2199_v12  ;;  %v2203_v34 = vor.u32 %v2412_v31, %v2202_v26  ;;  %v2146_v36 = vld [vmem:[%s3416_s28 + $0x30] sm:$0xf]  ;;  %v2190_v37 = vld [vmem:[%s3416_s28 + $0x80] sm:$0xf]  ;;  %v2409_v38 = vld [vmem:[%s3416_s28 + $0x88] sm:$0xf0]  ;;  %v2163_v39 = vor.u32 %v2401_v32, %v2160_v33 }
  0xaa   : > { %1073 = vmatpush.bf16.msra.mxu2 %v2215_v30  ;;  %v2399_v40 = vld [vmem:[%s3416_s28 + $0x38] sm:$0xf0]  ;;  %v2398_v41 = vld [vmem:[%s3416_s28 + $0x34] sm:$0xf]  ;;  %v2148_v42 = vld [vmem:[%s3416_s28 + $0x3c] sm:$0xf0]  ;;  %v2191_v43 = vor.u32 %v2409_v38, %v2190_v37 }
  0xab   : > { %v2147_v44 = vor.u32 %v2399_v40, %v2146_v36  ;;  %v2178_v45 = vld [vmem:[%s3416_s28 + $0x68] sm:$0xf]  ;;  %v2406_v46 = vld [vmem:[%s3416_s28 + $0x70] sm:$0xf0]  ;;  %v2151_v47 = vor.u32 %v2398_v41, %v2148_v42  ;;  %v2134_v48 = vld [vmem:[%s3416_s28 + $0x18] sm:$0xf] }
  0xac   : > { %1049 = vmatpush.bf16.msra.mxu0 %v2183_v17  ;;  %v2396_v49 = vld [vmem:[%s3416_s28 + $0x20] sm:$0xf0]  ;;  %v2395_v50 = vld [vmem:[%s3416_s28 + $0x1c] sm:$0xf]  ;;  %v2136_v51 = vld [vmem:[%s3416_s28 + $0x24] sm:$0xf0]  ;;  %v2179_v52 = vor.u32 %v2406_v46, %v2178_v45 }
  0xad   : > { %1062 = vmatpush.bf16.msra.mxu1 %v2187_v18  ;;  %v2135_v53 = vor.u32 %v2396_v49, %v2134_v48  ;;  %v2166_v54 = vld [vmem:[%s3416_s28 + $0x50] sm:$0xf]  ;;  %v2403_v55 = vld [vmem:[%s3416_s28 + $0x58] sm:$0xf0]  ;;  %v2139_v56 = vor.u32 %v2395_v50, %v2136_v51  ;;  %v2122_v57 = vld [vmem:[%s3416_s28] sm:$0xf] }
  0xae   : > { %1074 = vmatpush.bf16.msra.mxu2 %v2203_v34  ;;  %v2393_v58 = vld [vmem:[%s3416_s28 + $0x8] sm:$0xf0]  ;;  %v2392_v59 = vld [vmem:[%s3416_s28 + $0x4] sm:$0xf]  ;;  %v2124_v60 = vld [vmem:[%s3416_s28 + $0xc] sm:$0xf0]  ;;  %v2167_v61 = vor.u32 %v2403_v55, %v2166_v54 }
  0xaf   : > { %v2123_v62 = vor.u32 %v2393_v58, %v2122_v57  ;;  %v3521_v63 = vld [vmem:[#allocation2] sm:$0xff]  ;;  %v2154_v0 = vld [vmem:[%s3416_s28 + $0x38] sm:$0xf]  ;;  %v2127_v2 = vor.u32 %v2392_v59, %v2124_v60  ;;  %v2397_v6 = vld [vmem:[%s3416_s28 + $0x28] sm:$0xf0]  ;;  %vm1093_vm0 = vcmask 261120  }
  0xb0   : > { %1050 = vmatpush.bf16.msra.mxu0 %v2171_v23  ;;  %v2400_v1 = vld [vmem:[%s3416_s28 + $0x40] sm:$0xf0]  ;;  %v878_v3 = vpack.c.bf16 %v3521_v63, %v3521_v63  ;;  %v2142_v5 = vld [vmem:[%s3416_s28 + $0x20] sm:$0xf]  ;;  %v2130_v8 = vld [vmem:[%s3416_s28 + $0x8] sm:$0xf] }
  0xb1   : > { %1063 = vmatpush.bf16.msra.mxu1 %v2175_v27  ;;  %v2155_v4 = vor.u32 %v2400_v1, %v2154_v0  ;;  %v2143_v7 = vor.u32 %v2397_v6, %v2142_v5  ;;  %v2394_v9 = vld [vmem:[%s3416_s28 + $0x10] sm:$0xf0]  ;;  %v911_v11 = vld [vmem:[%s3423_s6] sm:$0x7]  ;;  %s3063_s0 = smov 64   ;;  %s3064_s2 = smov 96  }
  0xb2   : > { %1075 = vmatpush.bf16.msra.mxu2 %v2191_v43  ;;  %v2131_v10 = vor.u32 %v2394_v9, %v2130_v8  ;;  %v913_v12 = vperm.slane %v911_v11, 0  ;;  %v914_v13 = vperm.slane %v911_v11, 1  ;;  %s3065_s4 = smov 32   ;;  %v915_v28 = vperm.slane %v911_v11, 2  ;;  %s3827_s10 = scalar_lea.vmem [#allocation7], %s3394_s19 }
  0xb3   : > { %vm1129_vm1 = vcmask 1043456   ;;  %v2614_v37 = vld [vmem:[%s3827_s10] ss:$0 sm:$0xff]  ;;  %vm1113_vm2 = vcmask 64512   ;;  %vm1216_vm3 = vcmask 523520   ;;  %vm1278_vm4 = vcmask 785920  }
  0xb4   : > { %1051 = vmatpush.bf16.msra.mxu0 %v2159_v35  ;;  %vm1340_vm5 = vcmask 1048320   ;;  %s3828_s28 = sld [smem:[#allocation50_spill]]  ;;  %s3831_s29 = scalar_lea.vmem [#allocation15], %s3413_s26 }
  0xb5   : > { %1064 = vmatpush.bf16.msra.mxu1 %v2163_v39  ;;  %s3835_s3 = sld [smem:[#allocation31_spill]] }
  0xb6   : > { %1076 = vmatpush.bf16.msra.mxu2 %v2179_v52 }
  0xb8   : > { %1052 = vmatpush.bf16.msra.mxu0 %v2147_v44 }
  0xb9   : > { %1065 = vmatpush.bf16.msra.mxu1 %v2151_v47 }
  0xba   : > { %1077 = vmatpush.bf16.msra.mxu2 %v2167_v61  ;;  %s3829_s6 = scalar_lea.vmem %s3828_s28, %s3447_s5 }
  0xbb   : > { %p2384_p12 = scmp.ne.s32.totalorder %s3835_s3, 1 }
  0xbc   : > { %1053 = vmatpush.bf16.msra.mxu0 %v2135_v53 }
  0xbd   : > { %1066 = vmatpush.bf16.msra.mxu1 %v2139_v56 }
  0xbe   : > { %1078 = vmatpush.bf16.msra.mxu2 %v2155_v4 }
  0xc0   : > { %1054 = vmatpush.bf16.msra.mxu0 %v2123_v62 }
  0xc1   : > { %1067 = vmatpush.bf16.msra.mxu1 %v2127_v2 }
  0xc2   : > { %1079 = vmatpush.bf16.msra.mxu2 %v2143_v7 }
  0xc3   : > { %1055 = vmatmul.bf16.vlgmr.msra.gmra.mxu0 %v878_v3 }
  0xc4   : > { %1068 = vmatmul.bf16.vlgmr.msra.gmra.mxu1 %v878_v3 }
  0xc6   : > { %1080 = vmatpush.bf16.msra.mxu2 %v2131_v10 }
  0xc9   : > { %1081 = vmatmul.bf16.vlgmr.msra.gmra.mxu2 %v878_v3 }
 0x140   : > { %v1056_v14 = vpop.f32.mrf.mxu0 }
 0x141   : > { %v1069_v15 = vpop.f32.mrf.mxu1  ;;  %v1057_v16 = vadd.f32 %v1056_v14, %v913_v12 }
 0x142   : > { %v1070_v17 = vadd.f32 %v1069_v15, %v914_v13 }
 0x143   : > { %v1087_v19 = vpack.c.bf16 %v1057_v16, %v1057_v16 }
 0x144   : > { %v1088_v18 = vpack.c.bf16 %v1070_v17, %v1070_v17 }
 0x145   : > { %v1148_v25 = vunpack.c.l.b16 %v1087_v19 }
 0x146   : > { %v1153_v20 = vunpack.c.l.b16 %v1088_v18  ;;  %v1098_v21 = vsel %vm1093_vm0, %v1088_v18, 0 }
 0x147   : > { %1107 = vmatpush.bf16.xpose.msra.mxu3 %v1098_v21  ;;  %v1149_v26 = vpack.c.b16 %v1148_v25, %v1148_v25 }
 0x148   : > { %v1154_v22 = vpack.c.b16 %v1153_v20, %v1153_v20  ;;  %v1058_v23 = vpop.f32.mrf.mxu0 }
 0x149   : > { %v1071_v24 = vpop.f32.mrf.mxu1 }
 0x14a   : > { %1220 = vrot.lane.b32.xlu2 %v1154_v22, %s3063_s0  ;;  %1155 = vrot.lane.b32.xlu1 %v1154_v22, %s3064_s2 }
 0x14c   : > { %v1082_v27 = vpop.f32.mrf.mxu2 }
 0x14d   : > { %v1083_v29 = vadd.f32 %v1082_v27, %v915_v28 }
 0x14e   : > { %2216 = vmatmul.msk.bf16.vlgmr.msra.gmra.mxu3 %vm1093_vm0, %v1087_v19 }
 0x14f   : > { %v1089_v31 = vpack.c.bf16 %v1083_v29, %v1083_v29 }
 0x151   : > { %v1131_v32 = vsel %vm1129_vm1, %v1089_v31, 0  ;;  %v1189_v7 = vunpack.c.l.b16 %v1089_v31 }
 0x152   : > { %1282 = vrot.lane.b32.xlu2 %v1154_v22, %s3065_s4  ;;  %1150 = vrot.lane.b32.xlu1 %v1149_v26, %s3064_s2 }
 0x153   : > { %1140 = vmatpush.bf16.msrb.mxu3 %v1131_v32  ;;  %v1190_v8 = vpack.c.b16 %v1189_v7, %v1189_v7 }
 0x154   : > { %v1084_v30 = vpop.f32.mrf.mxu2 }
 0x15a   : > { %1280 = vrot.lane.b32.xlu1 %v1149_v26, %s3065_s4 }
 0x1a4   : > { %v1221_v33 = vpop.permute.xlu2 %1220 }
 0x1a5   : > { %v1226_v34 = vsel %vm1093_vm0, %v1221_v33, 0 }
 0x1a6   : > { %1235 = vmatpush.bf16.xpose.msrb.mxu2 %v1226_v34 }
 0x1ac   : > { %v1283_v50 = vpop.permute.xlu2 %1282 }
 0x1ad   : > { %v1288_v52 = vsel %vm1093_vm0, %v1283_v50, 0  ;;  %v2421_v50 = vld [vmem:[%s3430_s23 + $0x28] sm:$0xff] }
 0x1bc   : > { %v1156_v35 = vpop.permute.xlu1 %1155 }
 0x1bd   : > { %v1161_v36 = vsel %vm1093_vm0, %v1156_v35, 0 }
 0x1be   : > { %1170 = vmatpush.bf16.xpose.msra.mxu3 %v1161_v36 }
 0x1c4   : > { %v1151_v54 = vpop.permute.xlu1 %1150 }
 0x1cc   : > { %v1281_v55 = vpop.permute.xlu1 %1280 }
 0x1d1   : > { %v1109_v38 = vpop.f32.mrf.mxu3 }
 0x1d2   : > { %v1110_v39 = vadd.f32 %v2614_v37, %v1109_v38 }
 0x1d4   : > { %v1114_v40 = vsel %vm1113_vm2, %v1110_v39, -inf }
 0x1d5   : > { %1115 = vmax.xlane.f32.xlu0 %v1114_v40 }
 0x1d9   : > { %v1111_v41 = vpop.f32.mrf.mxu3 }
 0x248   : > { %v1116_v42 = vpop.xlane.xlu0 %1115 }
 0x249   : > { %v1117_v43 = vsub.f32 %v1110_v39, %v1116_v42 }
 0x24b   : > { %v1118_v44 = vmul.f32 1.442695, %v1117_v43 }
 0x24d   : > { %2621 = vpow2.f32 %v1118_v44 }
 0x253   : > { %v2622_v45 = vpop.eup %2621 }
 0x254   : > { %v1120_v46 = vsel %vm1113_vm2, %v2622_v45, 0.0 }
 0x255   : > { %1121 = vadd.xlane.f32.xlu0 %v1120_v46 }
 0x269   : > { %1218 = vrot.lane.b32.xlu0 %v1149_v26, %s3063_s0 }
 0x2c8   : > { %v1122_v47 = vpop.xlane.xlu0 %1121 }
 0x2c9   : > { %2623 = vrcp.f32 %v1122_v47 }
 0x2cf   : > { %v2624_v48 = vpop.eup %2623 }
 0x2d0   : > { %v1124_v49 = vmul.f32 %v2624_v48, %v2622_v45  ;;  %v2423_v48 = vld [vmem:[%s3430_s23 + $0x38] sm:$0xff] }
 0x2d1   : > { %1412 = vmatpush.bf16.msrb.mxu1 %v2423_v48 }
 0x2d2   : > { %v1125_v51 = vpack.c.bf16 %v1124_v49, %v1124_v49  ;;  %v2422_v49 = vld [vmem:[%s3430_s23 + $0x30] sm:$0xff] }
 0x2d4   : > { %2217 = vmatmul.msk.bf16.vlgmr.msrb.gmra.mxu3 %vm1113_vm2, %v1125_v51  ;;  %v2420_v51 = vld [vmem:[%s3430_s23 + $0x20] sm:$0xff] }
 0x2d5   : > { %1297 = vmatpush.bf16.xpose.msrb.mxu3 %v1288_v52  ;;  %1413 = vmatpush.bf16.msrb.mxu1 %v2422_v49  ;;  %v2419_v52 = vld [vmem:[%s3430_s23 + $0x18] sm:$0xff]  ;;  %v2266_v49 = vld [vmem:[%s3439_s30 + $0x10] sm:$0xf] }
 0x2d9   : > { %1414 = vmatpush.bf16.msrb.mxu1 %v2421_v50  ;;  %v2427_v50 = vld [vmem:[%s3439_s30 + $0x14] sm:$0xf0] }
 0x2db   : > { %v1219_v53 = vpop.permute.xlu0 %1218 }
 0x2dc   : > { %2220 = vmatmul.msk.bf16.vlgmr.msrb.gmra.mxu2 %vm1093_vm0, %v1219_v53  ;;  %v2418_v53 = vld [vmem:[%s3430_s23 + $0x10] sm:$0xff] }
 0x2dd   : > { %1415 = vmatpush.bf16.msrb.mxu1 %v2420_v51  ;;  %v2426_v51 = vld [vmem:[%s3439_s30 + $0x14] sm:$0xf] }
 0x2e1   : > { %1416 = vmatpush.bf16.msrb.mxu1 %v2419_v52  ;;  %v2267_v52 = vor.u32 %v2427_v50, %v2266_v49 }
 0x2e4   : > { %2218 = vmatmul.msk.bf16.vlgmr.msra.gmra.mxu3 %vm1093_vm0, %v1151_v54 }
 0x2e5   : > { %1417 = vmatpush.bf16.msrb.mxu1 %v2418_v53  ;;  %v2268_v53 = vld [vmem:[%s3439_s30 + $0x18] sm:$0xf0] }
 0x2f4   : > { %2222 = vmatmul.msk.bf16.vlgmr.msrb.gmra.mxu3 %vm1093_vm0, %v1281_v55 }
 0x357   : > { %v1142_v56 = vpop.f32.mrf.mxu3 }
 0x358   : > { %1146 = vst.msk [vmem:[#allocation3] sm:$0xff] %vm1093_vm0, %v1142_v56  ;;  %v2417_v56 = vld [vmem:[%s3430_s23 + $0x8] sm:$0xff] }
 0x359   : > { %1418 = vmatpush.bf16.msrb.mxu1 %v2417_v56  ;;  %v2271_v56 = vor.u32 %v2426_v51, %v2268_v53 }
 0x35f   : > { %v1144_v57 = vpop.f32.mrf.mxu3  ;;  %v1237_v58 = vpop.f32.mrf.mxu2 }
 0x360   : > { %v1238_v59 = vadd.f32 %v2614_v37, %v1237_v58  ;;  %v2416_v57 = vld [vmem:[%s3430_s23] sm:$0xff]  ;;  %s3830_s23 = scalar_lea.vmem [#allocation13], %s3413_s26 }
 0x361   : > { %1419 = vmatpush.bf16.msrb.mxu1 %v2416_v57  ;;  %v2424_v57 = vld [vmem:[%s3439_s30 + $0x4] sm:$0xf] }
 0x362   : > { %v1241_v60 = vsel %vm1113_vm2, %v1238_v59, -inf }
 0x363   : > { %1242 = vmax.xlane.f32.xlu1 %v1241_v60 }
 0x367   : > { %v1172_v61 = vpop.f32.mrf.mxu3  ;;  %v1239_v62 = vpop.f32.mrf.mxu2 }
 0x368   : > { %v1173_v0 = vadd.f32 %v2614_v37, %v1172_v61  ;;  %v2615_v61 = vld [vmem:[%s3829_s6] ss:$0 sm:$0xff] }
 0x36a   : > { %v1176_v1 = vsel %vm1113_vm2, %v1173_v0, -inf }
 0x36b   : > { %1177 = vmax.xlane.f32.xlu2 %v1176_v1 }
 0x36f   : > { %v1174_v2 = vpop.f32.mrf.mxu3 }
 0x377   : > { %v1299_v3 = vpop.f32.mrf.mxu3 }
 0x378   : > { %v1300_v4 = vadd.f32 %v2614_v37, %v1299_v3  ;;  %v3066_v3 = vmov 128.0  }
 0x37a   : > { %v1303_v5 = vsel %vm1113_vm2, %v1300_v4, -inf }
 0x37b   : > { %1304 = vmax.xlane.f32.xlu0 %v1303_v5  ;;  %v2439_v5 = vld [vmem:[%s3439_s30 + $0x74] sm:$0xf0] }
 0x37f   : > { %v1301_v6 = vpop.f32.mrf.mxu3 }
 0x380   : > { %v2438_v6 = vld [vmem:[%s3439_s30 + $0x74] sm:$0xf] }
 0x38f   : > { %1253 = vrot.lane.b32.xlu0 %v1190_v8, %s3063_s0 }
 0x3d6   : > { %v1243_v9 = vpop.xlane.xlu1 %1242 }
 0x3d7   : > { %v1244_v10 = vsub.f32 %v1238_v59, %v1243_v9 }
 0x3d9   : > { %v1245_v11 = vmul.f32 1.442695, %v1244_v10 }
 0x3db   : > { %2625 = vpow2.f32 %v1245_v11 }
 0x3de   : > { %v1178_v12 = vpop.xlane.xlu2 %1177 }
 0x3df   : > { %v1179_v13 = vsub.f32 %v1173_v0, %v1178_v12 }
 0x3e1   : > { %v2626_v14 = vpop.eup %2625  ;;  %v1180_v15 = vmul.f32 1.442695, %v1179_v13 }
 0x3e2   : > { %v1247_v16 = vsel %vm1113_vm2, %v2626_v14, 0.0 }
 0x3e3   : > { %2627 = vpow2.f32 %v1180_v15  ;;  %1248 = vadd.xlane.f32.xlu1 %v1247_v16 }
 0x3e9   : > { %v2628_v17 = vpop.eup %2627 }
 0x3ea   : > { %v1182_v18 = vsel %vm1113_vm2, %v2628_v17, 0.0 }
 0x3eb   : > { %1183 = vadd.xlane.f32.xlu2 %v1182_v18 }
 0x3ee   : > { %v1305_v19 = vpop.xlane.xlu0 %1304 }
 0x3ef   : > { %v1306_v20 = vsub.f32 %v1300_v4, %v1305_v19  ;;  %v2314_v4 = vld [vmem:[%s3439_s30 + $0x70] sm:$0xf]  ;;  %v2306_v19 = vld [vmem:[%s3439_s30 + $0x60] sm:$0xf] }
 0x3f0   : > { %v2315_v7 = vor.u32 %v2439_v5, %v2314_v4  ;;  %v2445_v5 = vld [vmem:[%s3471_s21 + $0x28] sm:$0xff] }
 0x3f1   : > { %v1307_v21 = vmul.f32 1.442695, %v1306_v20  ;;  %v2437_v20 = vld [vmem:[%s3439_s30 + $0x64] sm:$0xf0] }
 0x3f3   : > { %2629 = vpow2.f32 %v1307_v21  ;;  %v2436_v21 = vld [vmem:[%s3439_s30 + $0x64] sm:$0xf] }
 0x3f9   : > { %v2630_v22 = vpop.eup %2629 }
 0x3fa   : > { %v1309_v23 = vsel %vm1113_vm2, %v2630_v22, 0.0 }
 0x3fb   : > { %1310 = vadd.xlane.f32.xlu1 %v1309_v23  ;;  %v2308_v23 = vld [vmem:[%s3439_s30 + $0x68] sm:$0xf0] }
 0x401   : > { %v1254_v24 = vpop.permute.xlu0 %1253 }
 0x402   : > { %v1259_v25 = vsel %vm1129_vm1, %v1254_v24, 0  ;;  %v2311_v24 = vor.u32 %v2436_v21, %v2308_v23  ;;  %v2617_v23 = vld [vmem:[%s3831_s29] ss:$0 sm:$0xff] }
 0x403   : > { %1191 = vrot.lane.b32.xlu2 %v1190_v8, %s3064_s2  ;;  %1268 = vmatpush.bf16.msra.mxu2 %v1259_v25  ;;  %v2298_v25 = vld [vmem:[%s3439_s30 + $0x50] sm:$0xf] }
 0x407   : > { %1566 = vmatpush.bf16.msrb.mxu2 %v2315_v7  ;;  %v2444_v7 = vld [vmem:[%s3471_s21 + $0x20] sm:$0xff] }
 0x414   : > { %1315 = vrot.lane.b32.xlu1 %v1190_v8, %s3065_s4  ;;  %v2316_v8 = vld [vmem:[%s3439_s30 + $0x78] sm:$0xf0] }
 0x415   : > { %v2319_v9 = vor.u32 %v2438_v6, %v2316_v8  ;;  %v2453_v6 = vld [vmem:[%s3471_s21 + $0x68] sm:$0xff]  ;;  %v2452_v8 = vld [vmem:[%s3471_s21 + $0x60] sm:$0xff] }
 0x417   : > { %1579 = vmatpush.bf16.msra.mxu3 %v2319_v9 }
 0x41b   : > { %1580 = vmatpush.bf16.msra.mxu3 %v2311_v24 }
 0x456   : > { %v1249_v26 = vpop.xlane.xlu1 %1248 }
 0x457   : > { %2631 = vrcp.f32 %v1249_v26  ;;  %v2435_v26 = vld [vmem:[%s3439_s30 + $0x54] sm:$0xf0] }
 0x45d   : > { %v2632_v27 = vpop.eup %2631 }
 0x45e   : > { %v1251_v28 = vmul.f32 %v2632_v27, %v2626_v14  ;;  %v1184_v29 = vpop.xlane.xlu2 %1183  ;;  %v2434_v27 = vld [vmem:[%s3439_s30 + $0x54] sm:$0xf] }
 0x45f   : > { %2633 = vrcp.f32 %v1184_v29  ;;  %v2300_v29 = vld [vmem:[%s3439_s30 + $0x58] sm:$0xf0] }
 0x460   : > { %v1252_v30 = vpack.c.bf16 %v1251_v28, %v1251_v28  ;;  %v2299_v28 = vor.u32 %v2435_v26, %v2298_v25 }
 0x462   : > { %2221 = vmatmul.msk.bf16.vlgmr.msra.gmra.mxu2 %vm1113_vm2, %v1252_v30  ;;  %v2303_v30 = vor.u32 %v2434_v27, %v2300_v29  ;;  %v2441_v27 = vld [vmem:[%s3471_s21 + $0x8] sm:$0xff]  ;;  %v2440_v29 = vld [vmem:[%s3471_s21] sm:$0xff] }
 0x464   : > { %1581 = vmatpush.bf16.msra.mxu3 %v2303_v30  ;;  %v2448_v30 = vld [vmem:[%s3471_s21 + $0x40] sm:$0xff] }
 0x465   : > { %v2634_v31 = vpop.eup %2633 }
 0x466   : > { %v1186_v32 = vmul.f32 %v2634_v31, %v2628_v17  ;;  %v1192_v33 = vpop.permute.xlu2 %1191  ;;  %v2290_v31 = vld [vmem:[%s3439_s30 + $0x40] sm:$0xf] }
 0x467   : > { %v1197_v34 = vsel %vm1129_vm1, %v1192_v33, 0  ;;  %v2432_v33 = vld [vmem:[%s3439_s30 + $0x44] sm:$0xf] }
 0x468   : > { %1206 = vmatpush.bf16.msrb.mxu0 %v1197_v34  ;;  %v1187_v35 = vpack.c.bf16 %v1186_v32, %v1186_v32  ;;  %v2433_v32 = vld [vmem:[%s3439_s30 + $0x44] sm:$0xf0] }
 0x469   : > { %v2291_v34 = vor.u32 %v2433_v32, %v2290_v31  ;;  %v1480_v31 = vld [vmem:[%s3457_s15] sm:$0x3] }
 0x46a   : > { %v1482_v32 = vperm.slane %v1480_v31, 0 }
 0x46b   : > { %2219 = vmatmul.msk.bf16.vlgmr.msrb.gmra.mxu0 %vm1113_vm2, %v1187_v35  ;;  %v2292_v35 = vld [vmem:[%s3439_s30 + $0x48] sm:$0xf0] }
 0x46e   : > { %v1311_v36 = vpop.xlane.xlu1 %1310 }
 0x46f   : > { %2635 = vrcp.f32 %v1311_v36  ;;  %v2295_v36 = vor.u32 %v2432_v33, %v2292_v35  ;;  %v1483_v33 = vperm.slane %v1480_v31, 1 }
 0x470   : > { %2637 = vrcp.f32 %v3066_v3  ;;  %v2454_v3 = vld [vmem:[%s3471_s21 + $0x70] sm:$0xff] }
 0x471   : > { %1582 = vmatpush.bf16.msra.mxu3 %v2295_v36 }
 0x475   : > { %v2636_v37 = vpop.eup %2635 }
 0x476   : > { %v1313_v38 = vmul.f32 %v2636_v37, %v2630_v22  ;;  %v2638_v10 = vpop.eup %2637  ;;  %v2307_v22 = vor.u32 %v2437_v20, %v2306_v19  ;;  %v2282_v37 = vld [vmem:[%s3439_s30 + $0x30] sm:$0xf]  ;;  %v2616_v20 = vld [vmem:[%s3830_s23] ss:$0 sm:$0xff] }
 0x477   : > { %v1431_v11 = vmul.f32 128.0, %v2638_v10  ;;  %vm1435_vm6 = vweird.f32 %v2638_v10 }
 0x478   : > { %v1314_v41 = vpack.c.bf16 %v1313_v38, %v1313_v38  ;;  %1567 = vmatpush.bf16.msrb.mxu2 %v2307_v22  ;;  %v2431_v38 = vld [vmem:[%s3439_s30 + $0x34] sm:$0xf0] }
 0x479   : > { %v1432_v12 = vsub.f32 1.0, %v1431_v11  ;;  %v2443_v11 = vld [vmem:[%s3471_s21 + $0x18] sm:$0xff] }
 0x47c   : > { %1568 = vmatpush.bf16.msrb.mxu2 %v2299_v28  ;;  %v2449_v28 = vld [vmem:[%s3471_s21 + $0x48] sm:$0xff] }
 0x480   : > { %1569 = vmatpush.bf16.msrb.mxu2 %v2291_v34 }
 0x486   : > { %v1316_v39 = vpop.permute.xlu1 %1315 }
 0x487   : > { %v1321_v40 = vsel %vm1129_vm1, %v1316_v39, 0  ;;  %v2430_v39 = vld [vmem:[%s3439_s30 + $0x34] sm:$0xf] }
 0x488   : > { %1330 = vmatpush.bf16.msra.mxu0 %v1321_v40  ;;  %v2283_v40 = vor.u32 %v2431_v38, %v2282_v37 }
 0x48a   : > { %1570 = vmatpush.bf16.msrb.mxu2 %v2283_v40 }
 0x48b   : > { %2223 = vmatmul.msk.bf16.vlgmr.msra.gmra.mxu0 %vm1113_vm2, %v1314_v41  ;;  %v2284_v41 = vld [vmem:[%s3439_s30 + $0x38] sm:$0xf0] }
 0x4e5   : > { %v1270_v42 = vpop.f32.mrf.mxu2 }
 0x4e8   : > { %v1208_v43 = vpop.f32.mrf.mxu0 }
 0x4e9   : > { %1213 = vrot.lane.b32.xlu2 %v1208_v43, %s3065_s4  ;;  %v2274_v43 = vld [vmem:[%s3439_s30 + $0x20] sm:$0xf] }
 0x4ed   : > { %v1272_v44 = vpop.f32.mrf.mxu2 }
 0x4ee   : > { %v2429_v44 = vld [vmem:[%s3439_s30 + $0x24] sm:$0xf0] }
 0x4f0   : > { %v1210_v45 = vpop.f32.mrf.mxu0 }
 0x4f1   : > { %1275 = vrot.lane.b32.xlu2 %v1270_v42, %s3063_s0  ;;  %v2287_v42 = vor.u32 %v2430_v39, %v2284_v41  ;;  %v2428_v45 = vld [vmem:[%s3439_s30 + $0x24] sm:$0xf] }
 0x4f3   : > { %1583 = vmatpush.bf16.msra.mxu3 %v2287_v42 }
 0x508   : > { %v1332_v46 = vpop.f32.mrf.mxu0 }
 0x509   : > { %1337 = vrot.lane.b32.xlu0 %v1332_v46, %s3064_s2  ;;  %v2275_v46 = vor.u32 %v2429_v44, %v2274_v43  ;;  %v2618_v43 = vld [vmem:[%s863_s27] ss:$0 sm:$0xff] }
 0x50b   : > { %1571 = vmatpush.bf16.msrb.mxu2 %v2275_v46 }
 0x50f   : > { %1572 = vmatpush.bf16.msrb.mxu2 %v2267_v52 }
 0x510   : > { %v1334_v47 = vpop.f32.mrf.mxu0 }
 0x511   : > { %v2276_v47 = vld [vmem:[%s3439_s30 + $0x28] sm:$0xf0] }
 0x512   : > { %v2279_v48 = vor.u32 %v2428_v45, %v2276_v47 }
 0x514   : > { %1584 = vmatpush.bf16.msra.mxu3 %v2279_v48 }
 0x518   : > { %1585 = vmatpush.bf16.msra.mxu3 %v2271_v56 }
 0x543   : > { %v1214_v54 = vpop.permute.xlu2 %1213 }
 0x544   : > { %1217 = vst.msk [vmem:[#allocation3] sm:$0xff] %vm1216_vm3, %v1214_v54  ;;  %v2258_v54 = vld [vmem:[%s3439_s30] sm:$0xf] }
 0x54b   : > { %v1276_v55 = vpop.permute.xlu2 %1275 }
 0x54c   : > { %1279 = vst.msk [vmem:[#allocation3] sm:$0xff] %vm1278_vm4, %v1276_v55  ;;  %v2425_v55 = vld [vmem:[%s3439_s30 + $0x4] sm:$0xf0] }
 0x57b   : > { %v1338_v58 = vpop.permute.xlu0 %1337 }
 0x57c   : > { %1341 = vst.msk [vmem:[#allocation3] sm:$0xff] %vm1340_vm5, %v1338_v58  ;;  %v2260_v58 = vld [vmem:[%s3439_s30 + $0x8] sm:$0xf0] }
 0x583   : > { %v1342_v59 = vld [vmem:[#allocation3] sm:$0xff] }
 0x584   : > { %v1343_v60 = vpack.c.bf16 %v1342_v59, %v1342_v59  ;;  %v2259_v59 = vor.u32 %v2425_v55, %v2258_v54 }
 0x586   : > { %1420 = vmatmul.bf16.vlgmr.msrb.gmra.mxu1 %v1343_v60  ;;  %v2263_v60 = vor.u32 %v2424_v57, %v2260_v58  ;;  %1573 = vmatpush.bf16.msrb.mxu2 %v2259_v59 }
 0x588   : > { %1586 = vmatpush.bf16.msra.mxu3 %v2263_v60 }
 0x603   : > { %v1421_v62 = vpop.f32.mrf.mxu1 }
 0x604   : > { %v1422_v0 = vadd.f32 %v2615_v61, %v1421_v62  ;;  %v2447_v61 = vld [vmem:[%s3471_s21 + $0x38] sm:$0xff] }
 0x605   : > { %v2455_v62 = vld [vmem:[%s3471_s21 + $0x78] sm:$0xff]  ;;  %1728 = vmatpush.bf16.msrb.mxu0 %v2447_v61 }
 0x606   : > { %v1425_v1 = vadd.f32 %v1422_v0, %v3521_v63  ;;  %v1433_v63 = vmul.f32 %v2638_v10, %v1432_v12  ;;  %1741 = vmatpush.bf16.msra.mxu1 %v2455_v62  ;;  %v2451_v12 = vld [vmem:[%s3471_s21 + $0x58] sm:$0xff] }
 0x608   : > { %1428 = vadd.xlane.f32.xlu2 %v1425_v1  ;;  %v1434_v13 = vadd.f32 %v2638_v10, %v1433_v63 }
 0x60a   : > { %v3589_v14 = vsel %vm1435_vm6, %v2638_v10, %v1434_v13  ;;  %1742 = vmatpush.bf16.msra.mxu1 %v2454_v3 }
 0x60b   : > { %v1423_v2 = vpop.f32.mrf.mxu1 }
 0x60c   : > { %v2446_v2 = vld [vmem:[%s3471_s21 + $0x30] sm:$0xff] }
 0x60d   : > { %1729 = vmatpush.bf16.msrb.mxu0 %v2446_v2 }
 0x60e   : > { %1743 = vmatpush.bf16.msra.mxu1 %v2453_v6 }
 0x611   : > { %1730 = vmatpush.bf16.msrb.mxu0 %v2445_v5 }
 0x612   : > { %1744 = vmatpush.bf16.msra.mxu1 %v2452_v8 }
 0x615   : > { %1731 = vmatpush.bf16.msrb.mxu0 %v2444_v7 }
 0x616   : > { %1745 = vmatpush.bf16.msra.mxu1 %v2451_v12 }
 0x619   : > { %1732 = vmatpush.bf16.msrb.mxu0 %v2443_v11 }
 0x67b   : > { %v1429_v15 = vpop.xlane.xlu2 %1428 }
 0x67c   : > { %v1437_v16 = vmul.f32 %v3589_v14, %v1429_v15  ;;  %v2442_v15 = vld [vmem:[%s3471_s21 + $0x10] sm:$0xff] }
 0x67d   : > { %1733 = vmatpush.bf16.msrb.mxu0 %v2442_v15 }
 0x67e   : > { %v3592_v17 = vsub.f32 %v1425_v1, %v1437_v16  ;;  %v2450_v16 = vld [vmem:[%s3471_s21 + $0x50] sm:$0xff] }
 0x67f   : > { %1746 = vmatpush.bf16.msra.mxu1 %v2450_v16 }
 0x680   : > { %v1439_v18 = vmul.f32 %v3592_v17, %v3592_v17 }
 0x681   : > { %1734 = vmatpush.bf16.msrb.mxu0 %v2441_v27 }
 0x682   : > { %1440 = vadd.xlane.f32.xlu0 %v1439_v18 }
 0x683   : > { %1747 = vmatpush.bf16.msra.mxu1 %v2449_v28 }
 0x685   : > { %1735 = vmatpush.bf16.msrb.mxu0 %v2440_v29 }
 0x687   : > { %1748 = vmatpush.bf16.msra.mxu1 %v2448_v30 }
 0x6f5   : > { %v1441_v0 = vpop.xlane.xlu0 %1440 }
 0x6f6   : > { %v1442_v1 = vmul.f32 %v1441_v0, %v3589_v14 }
 0x6f8   : > { %v1443_v4 = vadd.f32 1e-06, %v1442_v1  ;;  %v2619_v1 = vld [vmem:[%s866_s7] ss:$0 sm:$0xff] }
 0x6fa   : > { %2639 = vrsqrt.f32 %v1443_v4  ;;  %vm1450_vm8 = vweird.f32 %v1443_v4 }
 0x700   : > { %v2640_v9 = vpop.eup %2639 }
 0x701   : > { %v1445_v10 = vmul.f32 %v2640_v9, %v1443_v4  ;;  %vm1451_vm7 = vweird.f32 %v2640_v9 }
 0x702   : > { %vm1452_vm9 = vmor %vm1450_vm8, %vm1451_vm7 }
 0x703   : > { %v1446_v63 = vmul.f32 %v2640_v9, %v1445_v10 }
 0x705   : > { %v1447_v13 = vmul.f32 0.5, %v1446_v63 }
 0x707   : > { %v1448_v18 = vsub.f32 1.5, %v1447_v13 }
 0x709   : > { %v1449_v19 = vmul.f32 %v2640_v9, %v1448_v18 }
 0x70b   : > { %v1453_v21 = vsel %vm1452_vm9, %v2640_v9, %v1449_v19 }
 0x70c   : > { %v1454_v22 = vmul.f32 %v1453_v21, %v3592_v17 }
 0x70e   : > { %v1458_v24 = vmul.f32 %v2616_v20, %v1454_v22 }
 0x710   : > { %v1462_v25 = vadd.f32 %v2617_v23, %v1458_v24 }
 0x712   : > { %v1463_v26 = vpack.c.bf16 %v1462_v25, %v1462_v25 }
 0x714   : > { %1574 = vmatmul.bf16.vlgmr.msrb.gmra.mxu2 %v1463_v26  ;;  %1587 = vmatmul.bf16.vlgmr.msra.gmra.mxu3 %v1463_v26 }
 0x797   : > { %v1575_v17 = vpop.f32.mrf.mxu2  ;;  %v1588_v34 = vpop.f32.mrf.mxu3 }
 0x798   : > { %v1576_v35 = vadd.f32 %v1575_v17, %v1482_v32  ;;  %v1589_v36 = vadd.f32 %v1588_v34, %v1483_v33 }
 0x79a   : > { %v1592_v37 = vmax.f32 %v1576_v35, 0.0  ;;  %v1593_v38 = vmax.f32 %v1589_v36, 0.0 }
 0x79c   : > { %v1594_v39 = vpack.c.bf16 %v1592_v37, %v1592_v37  ;;  %v1595_v40 = vpack.c.bf16 %v1593_v38, %v1593_v38 }
 0x79e   : > { %1736 = vmatmul.bf16.vlgmr.msrb.gmra.mxu0 %v1594_v39  ;;  %1749 = vmatmul.bf16.vlgmr.msra.gmra.mxu1 %v1595_v40 }
 0x79f   : > { %v1577_v41 = vpop.f32.mrf.mxu2  ;;  %v1590_v42 = vpop.f32.mrf.mxu3 }
 0x81b   : > { %v1737_v44 = vpop.f32.mrf.mxu0  ;;  %v1750_v45 = vpop.f32.mrf.mxu1 }
 0x81c   : > { %v1738_v46 = vadd.f32 %v2618_v43, %v1737_v44 }
 0x81e   : > { %v1751_v47 = vadd.f32 %v1750_v45, %v1738_v46 }
 0x820   : > { %v1754_v48 = vadd.f32 %v1751_v47, %v1462_v25 }
 0x822   : > { %1757 = vadd.xlane.f32.xlu1 %v1754_v48 }
 0x823   : > { %v1739_v49 = vpop.f32.mrf.mxu0  ;;  %v1752_v50 = vpop.f32.mrf.mxu1 }
 0x895   : > { %v1758_v51 = vpop.xlane.xlu1 %1757 }
 0x896   : > { %v1759_v52 = vmul.f32 %v1758_v51, %v3589_v14 }
 0x898   : > { %v1760_v53 = vsub.f32 %v1754_v48, %v1759_v52 }
 0x89a   : > { %v1761_v54 = vmul.f32 %v1760_v53, %v1760_v53 }
 0x89c   : > { %1762 = vadd.xlane.f32.xlu2 %v1761_v54 }
 0x90f   : > { %v1763_v55 = vpop.xlane.xlu2 %1762 }
 0x910   : > { %v1764_v56 = vmul.f32 %v1763_v55, %v3589_v14  ;;  %v2620_v14 = vld [vmem:[%s869_s22] ss:$0 sm:$0xff] }
 0x912   : > { %v1765_v57 = vadd.f32 1e-06, %v1764_v56 }
 0x914   : > { %2641 = vrsqrt.f32 %v1765_v57  ;;  %vm1772_vm11 = vweird.f32 %v1765_v57 }
 0x91a   : > { %v2642_v58 = vpop.eup %2641 }
 0x91b   : > { %v1767_v59 = vmul.f32 %v2642_v58, %v1765_v57  ;;  %vm1773_vm10 = vweird.f32 %v2642_v58 }
 0x91c   : > { %vm1774_vm12 = vmor %vm1772_vm11, %vm1773_vm10 }
 0x91d   : > { %v1768_v60 = vmul.f32 %v2642_v58, %v1767_v59 }
 0x91f   : > { %v1769_v61 = vmul.f32 0.5, %v1768_v60 }
 0x921   : > { %v1770_v62 = vsub.f32 1.5, %v1769_v61 }
 0x923   : > { %v1771_v0 = vmul.f32 %v2642_v58, %v1770_v62 }
 0x925   : > { %v1775_v2 = vsel %vm1774_vm12, %v2642_v58, %v1771_v0 }
 0x926   : > { %v1776_v3 = vmul.f32 %v1775_v2, %v1760_v53 }
 0x928   : > { %v1780_v4 = vmul.f32 %v2619_v1, %v1776_v3  ;;  %1789 = sbr.rel (%p2384_p12) target bundleno = 2350 (0x92e), region = 120 }
 0x92a   : > { %v1784_v5 = vadd.f32 %v2620_v14, %v1780_v4 }
 0x92c   : > { %1785 = vst [vmem:[#allocation2] sm:$0xff] %v1784_v5 }
 0x92d   : > { %1790 = vst [vmem:[%s3475_s14] sm:$0xff] %v1784_v5 }
 0x92e PF: > { %s3836_s11 = sld [smem:[#allocation32_spill]]  ;;  %s1804_s22 = sshll.u32 %s3475_s14, 4  ;;  %s1805_s22 = int_to_ptr.vmem [resolvable:$true] %s1804_s22 }
 0x92f   : > { %s3838_s18 = sld [smem:[#allocation59_spill]]  ;;  %s1792_s4 = scalar_lea.sflag [#allocation6], %s3394_s19 }
 0x934   : > { %s2386_s15 = sshll.u32 %s3836_s11, 3 }
 0x935   : > { %s3839_s0 = smov %s3838_s18  ;;  %s1802_s5 = scalar_lea.hbm %s3838_s18, %s2386_s15 }
 0x936   : > { %s1806_s2 = sshll.u32 %s1802_s5, 4  ;;  %s2933_s6 = scalar_lea.hbm %s3839_s0, 16  ;;  %s1807_s2 = int_to_ptr.hbm [resolvable:$true] %s1806_s2 }
 0x937   : > { %s2927_s10 = sshra.s32 %s1807_s2, 4  ;;  %s2928_s10 = int_to_ptr.hbm [resolvable:$true] %s2927_s10 }
 0x938   : > { %s2929_s1 = scalar_lea.hbm %s2928_s10, 8  ;;  %p2934_p2 = scmp.lt.s32.totalorder %s2928_s10, %s3839_s0 }
 0x939   : > { %p2930_p13 = scmp.ne.s32.totalorder %s2928_s10, %s2929_s1  ;;  %p2935_p6 = scmp.lt.s32.totalorder %s2933_s6, %s2929_s1 }
 0x93b   : > { %p2931_p0 = pnand %p2930_p13, %p3265_p8  ;;  %p2936_p1 = por %p2935_p6, %p2934_p2 }
 0x93d   : > { %p2932_p5 = pneg %p2931_p0 }
 0x93f   : > { %p2937_p3 = pnand %p2936_p1, %p2932_p5 }
 0x941   : > { %2940 = shalt.err (!%p2937_p3)
}
 0x942   : > { %2480 = dma.vmem_to_hbm [thread:$0]  (%p3265_p8), %s1805_s22, 128, %s1807_s2, %s1792_s4  }
 0x943 PF: > { %s3840_s19 = sld [smem:[#allocation35_spill]] }
 0x944   : > { %s3841_s14 = sld [smem:[#allocation29_spill]] }
 0x949   : > { %p2515_p10 = scmp.ge.s32.totalorder %s3840_s19, 2 }
 0x94a   : > { %s1818_s21 = sand.u32 1, %s3841_s14  }
 0x94b   : > { %p2511_p11 = pnand %p2515_p10, %p3272_p9  ;;  %s1819_s12 = scalar_lea.sflag [#allocation6], %s1818_s21 }
 0x94d   : > { %p2512_p4 = pneg %p2511_p11 }
 0x94f   : > { %3010 = dma.done.wait (%p2512_p4), %s1819_s12, 128  }
 0x950   : > { %3012 = vsyncadd (%p2512_p4), %s1819_s12, 4294967168  ;;  %s42_s23 = sadd.s32 1, %s3840_s19   ;;  %s3843_s29 = sld [smem:[#allocation27_spill]] }
 0x951   : > { %p39_p7 = scmp.ge.s32.totalorder %s42_s23, 6   ;;  %s3844_s30 = sld [smem:[#allocation28_spill]] }
 0x952   : > { %s3845_s15 = sld [smem:[#allocation40_spill]]  ;;  %s3852_s16 = smov %s3031_s17 }
 0x953   : > { %s3846_s27 = sld [smem:[#allocation30_spill]] }
 0x954   : > { %s3847_s18 = sld [smem:[#allocation41_spill]] }
 0x955   : > { %s3848_s19 = sld [smem:[#allocation33_spill]]  ;;  %41 = sbr.rel (!%p39_p7) target bundleno = 33 (0x21), region = 240 }
 0x956   : > { %s3849_s20 = sld [smem:[#allocation34_spill]] }
 0x957   : > { %s3850_s21 = sld [smem:[#allocation37_spill]] }
 0x958   : > { %s3851_s22 = sld [smem:[#allocation38_spill]] }
 0x959   : > { %s3853_s17 = smov %s3846_s27 }
 0x95a   :  { %1825 = vsyncpa [#allocation5], 1 }
 0x95b   :  { %1827 = vsyncpa [#allocation5 + $0x1], 1 }
 0x95c   :  { %1828 = vsyncpa [#allocation8], 1 }
 0x95d   :  { %1830 = vsyncpa [#allocation8 + $0x1], 1 }
 0x95e   :  { %1831 = vsyncpa [#allocation11], 1 }
 0x95f   :  { %1833 = vsyncpa [#allocation11 + $0x1], 1 }
 0x960   :  { %1834 = vsyncpa [#allocation14], 1 }
 0x961   :  { %1836 = vsyncpa [#allocation14 + $0x1], 1 }
 0x962   :  { %1837 = vsyncpa [#allocation17], 1 }
 0x963   :  { %1839 = vsyncpa [#allocation17 + $0x1], 1 }
 0x964   :  { %1840 = vsyncpa [#allocation6], 1 }
 0x965   :  { %1842 = vsyncpa [#allocation6 + $0x1], 1 }

</bundles_post_ra>
